<compile_context>
chip_gen: v5e
topology: v5e:2x2
jax: 0.10.0
libtpu: 0.0.40
codegen_flags: <defaults>
</compile_context>

<pallas_src>
import functools
import math

import jax
import jax.numpy as jnp
from jax.experimental import pallas as pl
from jax.experimental.pallas import tpu as pltpu


def _transition_kernel(s_ref, a_ref, ws_ref, wq_ref, wa_ref, b_ref, out_ref):
    """One lane-dense batch tile.

    s_ref   : VMEM (TBR, r*S)  r state vectors per row, lane-dense
    a_ref   : VMEM (TBR, r*A)  r action vectors per row, lane-dense
    ws_ref  : VMEM (r*S, r*S)  kron(I_r, somask*Wl)        -- linear state features
    wq_ref  : VMEM (r*S, r*S)  kron(I_r, somask^2*Wq)      -- quadratic state features
    wa_ref  : VMEM (r*A, r*S)  kron(I_r, Wa)               -- action features
    b_ref   : VMEM (1,   r*S)  tiled 'ones'-feature weight row (bias)
    out_ref : VMEM (TBR, r*S)
    """
    s = s_ref[...]                                                         # (TBR, r*S)
    a = a_ref[...]                                                         # (TBR, r*A)
    acc = jnp.dot(s, ws_ref[...], preferred_element_type=jnp.float32)
    acc = acc + jnp.dot(s * s, wq_ref[...], preferred_element_type=jnp.float32)
    acc = acc + jnp.dot(a, wa_ref[...], preferred_element_type=jnp.float32)
    # residual `state +` kept exact on the VPU; bias lane-broadcasts over sublanes.
    out_ref[...] = (s + acc + b_ref[...]).astype(out_ref.dtype)


def _group_size(S, A):
    """Smallest r such that both r*S and r*A are multiples of 128 (lane-dense tiles)."""
    rS = 128 // math.gcd(S, 128)
    rA = 128 // math.gcd(A, 128)
    return (rS * rA) // math.gcd(rS, rA)


def _choose_row_tile(rows, max_rows):
    """Pick the sublane row-tile: big (overhead amortization), multiple of 8 (or full extent),
    and split into >=2 equal steps when free so both v7x TensorCores get a shard."""
    max_rows = max(8, (max_rows // 8) * 8)
    if rows <= max_rows:
        if rows >= 16 and rows % 16 == 0:
            return rows // 2            # two equal, 8-aligned grid steps (megacore-friendly)
        return rows                     # single full-extent tile (legal for any row count)
    n_steps = pl.cdiv(rows, max_rows)
    t = pl.cdiv(pl.cdiv(rows, n_steps), 8) * 8
    return min(t, max_rows)


def transition_forward(action, state, weight, somask, *, row_tile=1024):
    """JAX wrapper reproducing TransitionModel.forward.

    action : (..., A) f32
    state  : (..., S) f32
    weight : (1 + A + 2*S, S) f32
    somask : scalar
    returns: (..., S) f32 == state + features(action, state) @ weight
    """
    A = action.shape[-1]
    S = state.shape[-1]
    lead = state.shape[:-1]

    act2 = action.reshape(-1, A).astype(jnp.float32)
    st2 = state.reshape(-1, S).astype(jnp.float32)
    B = st2.shape[0]

    # ---- host-side parameter folding (exact, a few KB of work) -----------------------------
    w = weight.astype(jnp.float32)
    so = jnp.asarray(somask, jnp.float32)
    wb = w[0]                               # (S,)   'ones' feature -> bias
    wa = w[1:1 + A]                         # (A, S)
    wl = w[1 + A:1 + A + S]                 # (S, S)
    wq = w[1 + A + S:1 + A + 2 * S]         # (S, S)

    r = _group_size(S, A)                   # 64 for S=6, A=4 -> 384 / 256 lane rows
    eye_r = jnp.eye(r, dtype=jnp.float32)
    ws_bd = jnp.kron(eye_r, so * wl)                      # (r*S, r*S) block-diagonal
    wq_bd = jnp.kron(eye_r, (so * so) * wq)               # (r*S, r*S)
    wa_bd = jnp.kron(eye_r, wa)                           # (r*A, r*S)
    bias = jnp.tile(wb, r)[None, :]                       # (1,   r*S)

    # ---- row-group view of the activations (free reshape, no transpose/concat) -------------
    rows = pl.cdiv(B, r)
    tbr = _choose_row_tile(rows, row_tile)
    rows_pad = pl.cdiv(rows, tbr) * tbr
    B_pad = rows_pad * r
    if B_pad != B:
        # Ragged batch: pad the raw (B, S)/(B, A) slabs (only copy in the whole pipeline,
        # and only on ragged batches).  Padded lanes produce bias-only rows, sliced off below.
        st2 = jnp.pad(st2, ((0, B_pad - B), (0, 0)))
        act2 = jnp.pad(act2, ((0, B_pad - B), (0, 0)))
    s_rows = st2.reshape(rows_pad, r * S)                 # lane-dense, bitcast-only reshape
    a_rows = act2.reshape(rows_pad, r * A)

    rS, rA = r * S, r * A
    grid = (rows_pad // tbr,)

    cost = pl.CostEstimate(
        flops=2 * rows_pad * rS * (2 * rS + rA),
        transcendentals=0,
        bytes_accessed=rows_pad * (2 * rS + rA) * 4 + (2 * rS * rS + rA * rS + rS) * 4,
    )

    out_rows = pl.pallas_call(
        _transition_kernel,
        out_shape=jax.ShapeDtypeStruct((rows_pad, rS), jnp.float32),
        grid=grid,
        in_specs=[
            pl.BlockSpec((tbr, rS), lambda i: (i, 0)),    # state rows  (streamed, lane-dense)
            pl.BlockSpec((tbr, rA), lambda i: (i, 0)),    # action rows (streamed, lane-dense)
            pl.BlockSpec((rS, rS), lambda i: (0, 0)),     # Ws (grid-invariant, VMEM-resident)
            pl.BlockSpec((rS, rS), lambda i: (0, 0)),     # Wq (grid-invariant)
            pl.BlockSpec((rA, rS), lambda i: (0, 0)),     # Wa (grid-invariant)
            pl.BlockSpec((1, rS), lambda i: (0, 0)),      # bias (grid-invariant)
        ],
        out_specs=pl.BlockSpec((tbr, rS), lambda i: (i, 0)),
        compiler_params=pltpu.CompilerParams(
            dimension_semantics=("parallel",),
            vmem_limit_bytes=32 * 1024 * 1024,            # ~11 MiB used at row_tile=1024
        ),
        cost_estimate=cost,
    )(s_rows, a_rows, ws_bd, wq_bd, wa_bd, bias)

    out = out_rows.reshape(B_pad, S)                      # free reshape back to (B_pad, S)
    if B_pad != B:
        out = out[:B]
    return out.reshape(*lead, S)


def _reference_forward(action, state, weight, somask):
    """Plain-JAX reference (mirrors the torch code 1:1) for correctness check."""
    A = action.shape[-1]
    S = state.shape[-1]
    act2 = action.reshape(-1, A).astype(jnp.float32)
    st2 = state.reshape(-1, S).astype(jnp.float32)
    ones = jnp.ones((act2.shape[0], 1), jnp.float32)
    m = st2 * somask
    feats = jnp.concatenate([ones, act2, m, m * m], axis=-1)
    sd = feats @ weight.astype(jnp.float32)
    return (st2 + sd).reshape(*state.shape[:-1], S)


if __name__ == "__main__":
    key = jax.random.PRNGKey(0)
    k_act, k_st, k_w = jax.random.split(key, 3)

    # Shapes consistent with the module: state_size=(6,), action_size=(4,), batched over
    # leading dims (2, 512) -> flattened batch 1024 = 16 row-groups of 64 -> a 2-step grid.
    action_dim = 4
    state_dim = 6
    feature_size = 1 + action_dim + 2 * state_dim   # ones + action + state + state**2

    action = jax.random.normal(k_act, (2, 512, action_dim), dtype=jnp.float32)
    state = jax.random.normal(k_st, (2, 512, state_dim), dtype=jnp.float32)

    # torch __init__ zeros the weight; use nonzero deterministic values so the matmul path
    # is exercised, and a non-unity somask so the host-side folding is exercised too.
    weight = 0.05 * jax.random.normal(k_w, (feature_size, state_dim), dtype=jnp.float32)
    somask = 0.5   # config.get('dynamics_somask', 1) — any scalar value is supported

    fwd = jax.jit(functools.partial(transition_forward, row_tile=1024))
    out = fwd(action, state, weight, somask)
    jax.block_until_ready(out)

    ref = _reference_forward(action, state, weight, somask)
    assert out.shape == state.shape, (out.shape, state.shape)
    assert jnp.allclose(out, ref, rtol=1e-5, atol=1e-5), float(jnp.max(jnp.abs(out - ref)))

    print("KERNEL_OK")
</pallas_src>

<mosaic_0001>
module attributes {stable_mosaic.version = 11 : i64} {
  func.func @_transition_kernel(%arg0: i32, %arg1: memref<8x384xf32, #tpu.memory_space<vmem>>, %arg2: memref<8x256xf32, #tpu.memory_space<vmem>>, %arg3: memref<384x384xf32, #tpu.memory_space<vmem>>, %arg4: memref<384x384xf32, #tpu.memory_space<vmem>>, %arg5: memref<256x384xf32, #tpu.memory_space<vmem>>, %arg6: memref<1x384xf32, #tpu.memory_space<vmem>>, %arg7: memref<8x384xf32, #tpu.memory_space<vmem>>) attributes {dimension_semantics = [#tpu.dimension_semantics<parallel>], iteration_bounds = array<i64: 2>, scalar_prefetch = 0 : i64, scratch_operands = 0 : i64, tpu.core_type = #tpu.core_type<tc>, window_params = [{transform_indices = @transform_0, window_bounds = array<i64: 8, 384>}, {transform_indices = @transform_1, window_bounds = array<i64: 8, 256>}, {pipeline_mode = #tpu.pipeline_mode<synchronous>, transform_indices = @transform_2, window_bounds = array<i64: 384, 384>}, {pipeline_mode = #tpu.pipeline_mode<synchronous>, transform_indices = @transform_3, window_bounds = array<i64: 384, 384>}, {pipeline_mode = #tpu.pipeline_mode<synchronous>, transform_indices = @transform_4, window_bounds = array<i64: 256, 384>}, {pipeline_mode = #tpu.pipeline_mode<synchronous>, transform_indices = @transform_5, window_bounds = array<i64: 1, 384>}, {transform_indices = @transform_6, window_bounds = array<i64: 8, 384>}]} {
    %c0 = arith.constant 0 : index
    %c0_0 = arith.constant 0 : index
    %0 = vector.load %arg1[%c0, %c0_0] : memref<8x384xf32, #tpu.memory_space<vmem>>, vector<8x384xf32>
    %c0_1 = arith.constant 0 : index
    %c0_2 = arith.constant 0 : index
    %1 = vector.load %arg2[%c0_1, %c0_2] : memref<8x256xf32, #tpu.memory_space<vmem>>, vector<8x256xf32>
    %c0_3 = arith.constant 0 : index
    %c0_4 = arith.constant 0 : index
    %2 = vector.load %arg3[%c0_3, %c0_4] : memref<384x384xf32, #tpu.memory_space<vmem>>, vector<384x384xf32>
    %cst = arith.constant dense<0.000000e+00> : vector<8x384xf32>
    %3 = tpu.matmul %0, %2, %cst {dimension_numbers = #tpu.dot_dimension_numbers<[1], [0], [0], [1], [0, 0, 1, 1], [], []>} : vector<8x384xf32>, vector<384x384xf32>, vector<8x384xf32> -> vector<8x384xf32>
    %4 = arith.mulf %0, %0 : vector<8x384xf32>
    %c0_5 = arith.constant 0 : index
    %c0_6 = arith.constant 0 : index
    %5 = vector.load %arg4[%c0_5, %c0_6] : memref<384x384xf32, #tpu.memory_space<vmem>>, vector<384x384xf32>
    %cst_7 = arith.constant dense<0.000000e+00> : vector<8x384xf32>
    %6 = tpu.matmul %4, %5, %cst_7 {dimension_numbers = #tpu.dot_dimension_numbers<[1], [0], [0], [1], [0, 0, 1, 1], [], []>} : vector<8x384xf32>, vector<384x384xf32>, vector<8x384xf32> -> vector<8x384xf32>
    %7 = arith.addf %3, %6 : vector<8x384xf32>
    %c0_8 = arith.constant 0 : index
    %c0_9 = arith.constant 0 : index
    %8 = vector.load %arg5[%c0_8, %c0_9] : memref<256x384xf32, #tpu.memory_space<vmem>>, vector<256x384xf32>
    %cst_10 = arith.constant dense<0.000000e+00> : vector<8x384xf32>
    %9 = tpu.matmul %1, %8, %cst_10 {dimension_numbers = #tpu.dot_dimension_numbers<[1], [0], [0], [1], [0, 0, 1, 1], [], []>} : vector<8x256xf32>, vector<256x384xf32>, vector<8x384xf32> -> vector<8x384xf32>
    %10 = arith.addf %7, %9 : vector<8x384xf32>
    %11 = arith.addf %0, %10 : vector<8x384xf32>
    %c0_11 = arith.constant 0 : index
    %c0_12 = arith.constant 0 : index
    %12 = vector.load %arg6[%c0_11, %c0_12] : memref<1x384xf32, #tpu.memory_space<vmem>>, vector<1x384xf32>
    %13 = vector.broadcast %12 : vector<1x384xf32> to vector<8x384xf32>
    %14 = arith.addf %11, %13 : vector<8x384xf32>
    %c0_13 = arith.constant 0 : index
    %c0_14 = arith.constant 0 : index
    %15 = vector.load %arg7[%c0_13, %c0_14] : memref<8x384xf32, #tpu.memory_space<vmem>>, vector<8x384xf32>
    tpu.vector_store %arg7[%c0_13, %c0_14], %14 {strides = array<i32>} : memref<8x384xf32, #tpu.memory_space<vmem>>, vector<8x384xf32>,
    return
  }
  func.func @transform_0(%arg0: i32) -> (i32, i32) {
    %c0_i32 = arith.constant 0 : i32
    %c0_i32_0 = arith.constant 0 : i32
    return %arg0, %c0_i32 : i32, i32
  }
  func.func @transform_1(%arg0: i32) -> (i32, i32) {
    %c0_i32 = arith.constant 0 : i32
    %c0_i32_0 = arith.constant 0 : i32
    return %arg0, %c0_i32 : i32, i32
  }
  func.func @transform_2(%arg0: i32) -> (i32, i32) {
    %c0_i32 = arith.constant 0 : i32
    %c0_i32_0 = arith.constant 0 : i32
    %c0_i32_1 = arith.constant 0 : i32
    return %c0_i32, %c0_i32_0 : i32, i32
  }
  func.func @transform_3(%arg0: i32) -> (i32, i32) {
    %c0_i32 = arith.constant 0 : i32
    %c0_i32_0 = arith.constant 0 : i32
    %c0_i32_1 = arith.constant 0 : i32
    return %c0_i32, %c0_i32_0 : i32, i32
  }
  func.func @transform_4(%arg0: i32) -> (i32, i32) {
    %c0_i32 = arith.constant 0 : i32
    %c0_i32_0 = arith.constant 0 : i32
    %c0_i32_1 = arith.constant 0 : i32
    return %c0_i32, %c0_i32_0 : i32, i32
  }
  func.func @transform_5(%arg0: i32) -> (i32, i32) {
    %c0_i32 = arith.constant 0 : i32
    %c0_i32_0 = arith.constant 0 : i32
    %c0_i32_1 = arith.constant 0 : i32
    return %c0_i32, %c0_i32_0 : i32, i32
  }
  func.func @transform_6(%arg0: i32) -> (i32, i32) {
    %c0_i32 = arith.constant 0 : i32
    %c0_i32_0 = arith.constant 0 : i32
    return %arg0, %c0_i32 : i32, i32
  }
}

</mosaic_0001>

<bundles_post_ra>
// kernel: tile.6
= control target key start
LH: loop header
LB: loop body
LE: loop exit
PB: predicated region body
PF: predicated region fallthrough
CT: control target
= control target key end

     0   :  { %s64_s0 = inlined_call_operand.vmem [shape: f32[6], index: 0, kind: input, shape index: {}]   ;;  %s65_s1 = inlined_call_operand.vmem [shape: f32[64,6], index: 1, kind: output, shape index: {}]  }
   0x1   :  { %v4_v0 = vld [vmem:[%s64_s0] ss:$0 sm:$0xff] }
   0x2   :  { %5 = vst [vmem:[%s65_s1] sm:$0xff] %v4_v0 }
   0x3   :  { %20 = vst [vmem:[%s65_s1 + $0x8] sm:$0xff] %v4_v0 }
   0x4   :  { %21 = vst [vmem:[%s65_s1 + $0x10] sm:$0xff] %v4_v0 }
   0x5   :  { %22 = vst [vmem:[%s65_s1 + $0x18] sm:$0xff] %v4_v0 }
   0x6   :  { %23 = vst [vmem:[%s65_s1 + $0x20] sm:$0xff] %v4_v0 }
   0x7   :  { %24 = vst [vmem:[%s65_s1 + $0x28] sm:$0xff] %v4_v0 }
   0x8   :  { %25 = vst [vmem:[%s65_s1 + $0x30] sm:$0xff] %v4_v0 }
   0x9   :  { %26 = vst [vmem:[%s65_s1 + $0x38] sm:$0xff] %v4_v0 }

// kernel: tile.7
= control target key start
LH: loop header
LB: loop body
LE: loop exit
PB: predicated region body
PF: predicated region fallthrough
CT: control target
= control target key end

     0   :  { %vm9_vm0 = vcmask 15360   ;;  %s587_s10 = smov 122   ;;  %s588_s13 = smov 126   ;;  %vm13_vm1 = vcmask 31744   ;;  %vm3_vm2 = vcmask 48128   ;;  %vm16_vm3 = vcmask 1048560   ;;  %s871_s0 = inlined_call_operand.vmem [shape: f32[64,6], index: 0, kind: input, shape index: {}]   ;;  %s872_s1 = inlined_call_operand.vmem [shape: f32[1,384], index: 1, kind: output, shape index: {}]  }
   0x1   :  { %v461_v0 = vld [vmem:[%s871_s0 + $0x3f] sm:$0x1]   ;;  %v457_v1 = vld [vmem:[%s871_s0 + $0x15] sm:$0x1]   ;;  %v463_v4 = vld [vmem:[%s871_s0 + $0x29] sm:$0x1]  }
   0x2   :  { %34 = vrot.lane.b32.xlu1 %v461_v0, %s587_s10  ;;  %v458_v2 = vld [vmem:[%s871_s0 + $0x15] sm:$0x1]   ;;  %v459_v5 = vld [vmem:[%s871_s0 + $0x2a] sm:$0x1]   ;;  %s589_s20 = smov 118   ;;  %s590_s23 = smov 120  }
   0x3   :  { %v10_v3 = vsel %vm9_vm0, %v458_v2, %v457_v1  ;;  %v460_v6 = vld [vmem:[%s871_s0 + $0x2a] sm:$0x1]   ;;  %47 = vrot.lane.b32.xlu2 %v463_v4, %s589_s20  ;;  %v462_v7 = vld [vmem:[%s871_s0 + $0x14] sm:$0x1]   ;;  %v464_v9 = vld [vmem:[%s871_s0 + $0x3e] sm:$0x1]  }
   0x4   :  { %11 = vrot.lane.b32.xlu0 %v10_v3, %s588_s13  ;;  %v23_v8 = vsel %vm13_vm1, %v460_v6, %v459_v5  ;;  %s591_s26 = smov 124   ;;  %s592_s27 = smov 116   ;;  %v466_v10 = vld [vmem:[%s871_s0 + $0x28] sm:$0x1]   ;;  %v465_v11 = vld [vmem:[%s871_s0 + $0x13] sm:$0x1]  }
   0x5   :  { %s593_s3 = smov 112   ;;  %v467_v12 = vld [vmem:[%s871_s0 + $0x3d] sm:$0x1]   ;;  %s594_s6 = smov 114   ;;  %v469_v13 = vld [vmem:[%s871_s0 + $0x27] sm:$0x1]  }
   0x6   :  { %s595_s7 = smov 110   ;;  %v468_v14 = vld [vmem:[%s871_s0 + $0x12] sm:$0x1]   ;;  %s596_s12 = smov 106   ;;  %v470_v15 = vld [vmem:[%s871_s0 + $0x3c] sm:$0x1]  }
   0x7   :  { %s597_s15 = smov 108   ;;  %s598_s16 = smov 104   ;;  %v472_v16 = vld [vmem:[%s871_s0 + $0x26] sm:$0x1]   ;;  %v471_v17 = vld [vmem:[%s871_s0 + $0x11] sm:$0x1]  }
   0x8   :  { %s599_s21 = smov 100   ;;  %v473_v18 = vld [vmem:[%s871_s0 + $0x3b] sm:$0x1]   ;;  %s600_s24 = smov 102   ;;  %v475_v19 = vld [vmem:[%s871_s0 + $0x25] sm:$0x1]  }
   0x9   :  { %s601_s25 = smov 98   ;;  %v474_v20 = vld [vmem:[%s871_s0 + $0x10] sm:$0x1]   ;;  %s602_s30 = smov 94   ;;  %v476_v21 = vld [vmem:[%s871_s0 + $0x3a] sm:$0x1]  }
   0xa   :  { %41 = vrot.lane.b32.xlu1 %v462_v7, %s590_s23  ;;  %s603_s4 = smov 96   ;;  %s604_s5 = smov 92   ;;  %v478_v22 = vld [vmem:[%s871_s0 + $0x24] sm:$0x1]   ;;  %v477_v23 = vld [vmem:[%s871_s0 + $0xf] sm:$0x1]  }
   0xb   :  { %54 = vrot.lane.b32.xlu2 %v464_v9, %s592_s27  ;;  %s605_s10 = smov 88   ;;  %v479_v24 = vld [vmem:[%s871_s0 + $0x39] sm:$0x1]   ;;  %s606_s13 = smov 90   ;;  %v481_v25 = vld [vmem:[%s871_s0 + $0x23] sm:$0x1]  }
   0xc   :  { %24 = vrot.lane.b32.xlu0 %v23_v8, %s591_s26  ;;  %s607_s14 = smov 86   ;;  %v480_v26 = vld [vmem:[%s871_s0 + $0xe] sm:$0x1]   ;;  %s608_s19 = smov 82   ;;  %v482_v27 = vld [vmem:[%s871_s0 + $0x38] sm:$0x1]  }
   0xd   :  { %s609_s22 = smov 84   ;;  %s610_s23 = smov 80   ;;  %v484_v28 = vld [vmem:[%s871_s0 + $0x22] sm:$0x1]   ;;  %v483_v29 = vld [vmem:[%s871_s0 + $0xd] sm:$0x1]  }
   0xe   :  { %s611_s28 = smov 76   ;;  %v485_v30 = vld [vmem:[%s871_s0 + $0x37] sm:$0x1]   ;;  %s612_s2 = smov 78   ;;  %v487_v31 = vld [vmem:[%s871_s0 + $0x21] sm:$0x1]  }
   0xf   :  { %v486_v32 = vld [vmem:[%s871_s0 + $0xc] sm:$0x1]   ;;  %s614_s8 = smov 70   ;;  %v488_v33 = vld [vmem:[%s871_s0 + $0x36] sm:$0x1]   ;;  %s615_s11 = smov 72  }
  0x10   :  { %v490_v34 = vld [vmem:[%s871_s0 + $0x20] sm:$0x1]   ;;  %v489_v35 = vld [vmem:[%s871_s0 + $0xb] sm:$0x1]   ;;  %s617_s17 = smov 64   ;;  %s618_s20 = smov 66  }
  0x11   :  { %v491_v36 = vld [vmem:[%s871_s0 + $0x35] sm:$0x1]   ;;  %v2_v37 = vld [vmem:[%s871_s0] sm:$0x1]   ;;  %v493_v38 = vld [vmem:[%s871_s0 + $0x1f] sm:$0x1]  }
  0x12   :  { %67 = vrot.lane.b32.xlu1 %v466_v10, %s593_s3  ;;  %s613_s3 = smov 74   ;;  %4 = vst.msk [vmem:[#allocation0] sm:$0x1] %vm3_vm2, %v2_v37   ;;  %v492_v39 = vld [vmem:[%s871_s0 + $0xa] sm:$0x1]   ;;  %s629_s26 = smov 40  }
  0x13   :  { %74 = vrot.lane.b32.xlu2 %v467_v12, %s595_s7  ;;  %v494_v40 = vld [vmem:[%s871_s0 + $0x34] sm:$0x1]   ;;  %v496_v41 = vld [vmem:[%s871_s0 + $0x1e] sm:$0x1]   ;;  %v495_v43 = vld [vmem:[%s871_s0 + $0x9] sm:$0x1]  }
  0x14   :  { %61 = vrot.lane.b32.xlu0 %v465_v11, %s594_s6  ;;  %v497_v44 = vld [vmem:[%s871_s0 + $0x33] sm:$0x1]   ;;  %v499_v45 = vld [vmem:[%s871_s0 + $0x1d] sm:$0x1]   ;;  %v498_v47 = vld [vmem:[%s871_s0 + $0x8] sm:$0x1]  }
  0x15   :  { %v500_v48 = vld [vmem:[%s871_s0 + $0x32] sm:$0x1]   ;;  %v502_v49 = vld [vmem:[%s871_s0 + $0x1c] sm:$0x1]   ;;  %v501_v51 = vld [vmem:[%s871_s0 + $0x7] sm:$0x1]  }
  0x16   :  { %v503_v52 = vld [vmem:[%s871_s0 + $0x31] sm:$0x1]   ;;  %s630_s29 = smov 42   ;;  %v505_v55 = vld [vmem:[%s871_s0 + $0x1b] sm:$0x1]   ;;  %s632_s6 = smov 34  }
  0x17   :  { %v504_v57 = vld [vmem:[%s871_s0 + $0x6] sm:$0x1]   ;;  %vm43_vm4 = vcmask 1032128   ;;  %v506_v58 = vld [vmem:[%s871_s0 + $0x30] sm:$0x1]   ;;  %s633_s9 = smov 36  }
  0x18   :  { %vm29_vm5 = vcmask 1048544   ;;  %vm36_vm6 = vcmask 1048528   ;;  %vm49_vm7 = vcmask 1015728   ;;  %v508_v61 = vld [vmem:[%s871_s0 + $0x1a] sm:$0x1]   ;;  %vm56_vm8 = vcmask 999328  }
  0x19   :  { %v507_v63 = vld [vmem:[%s871_s0 + $0x5] sm:$0x1]   ;;  %vm76_vm9 = vcmask 950128   ;;  %vm69_vm10 = vcmask 966528   ;;  %vm96_vm11 = vcmask 900928   ;;  %s636_s18 = smov 30  }
  0x1a   :  { %87 = vrot.lane.b32.xlu1 %v469_v13, %s596_s12  ;;  %s616_s12 = smov 68   ;;  %v509_v0 = vld [vmem:[%s871_s0 + $0x2f] sm:$0x1]   ;;  %vm63_vm12 = vcmask 982928   ;;  %vm116_vm13 = vcmask 851728   ;;  %vm136_vm14 = vcmask 802528  }
  0x1b   :  { %94 = vrot.lane.b32.xlu2 %v470_v15, %s598_s16  ;;  %v511_v3 = vld [vmem:[%s871_s0 + $0x19] sm:$0x1]   ;;  %v510_v5 = vld [vmem:[%s871_s0 + $0x4] sm:$0x1]   ;;  %vm89_vm15 = vcmask 917328   ;;  %s639_s27 = smov 24  }
  0x1c   :  { %81 = vrot.lane.b32.xlu0 %v468_v14, %s597_s15  ;;  %s635_s15 = smov 28   ;;  %v512_v6 = vld [vmem:[%s871_s0 + $0x2e] sm:$0x1]   ;;  %v514_v9 = vld [vmem:[%s871_s0 + $0x18] sm:$0x1]   ;;  %vm109_vm2 = vcmask 868128  }
  0x1d   :  { %v513_v11 = vld [vmem:[%s871_s0 + $0x3] sm:$0x1]   ;;  %v515_v12 = vld [vmem:[%s871_s0 + $0x2d] sm:$0x1]   ;;  %s642_s7 = smov 18   ;;  %s645_s16 = smov 12  }
  0x1e   :  { %v517_v15 = vld [vmem:[%s871_s0 + $0x17] sm:$0x1]  }
  0x22   :  { %107 = vrot.lane.b32.xlu1 %v472_v16, %s599_s21  ;;  %s628_s21 = smov 44  }
  0x23   :  { %114 = vrot.lane.b32.xlu2 %v473_v18, %s601_s25  ;;  %v518_v18 = vld [vmem:[%s871_s0 + $0x2c] sm:$0x1]   ;;  %s649_s25 = smov 2  }
  0x24   :  { %101 = vrot.lane.b32.xlu0 %v471_v17, %s600_s24  ;;  %s638_s24 = smov 22   ;;  %v516_v17 = vld [vmem:[%s871_s0 + $0x2] sm:$0x1]  }
  0x2a   :  { %127 = vrot.lane.b32.xlu1 %v475_v19, %s602_s30  ;;  %s631_s30 = smov 38  }
  0x2b   :  { %134 = vrot.lane.b32.xlu2 %v476_v21, %s604_s5  ;;  %v520_v21 = vld [vmem:[%s871_s0 + $0x16] sm:$0x1]  }
  0x2c   :  { %121 = vrot.lane.b32.xlu0 %v474_v20, %s603_s4  ;;  %s641_s4 = smov 16  }
  0x32   :  { %147 = vrot.lane.b32.xlu1 %v478_v22, %s605_s10  ;;  %s634_s10 = smov 32  }
  0x33   :  { %154 = vrot.lane.b32.xlu2 %v479_v24, %s607_s14  ;;  %v521_v24 = vld [vmem:[%s871_s0 + $0x2b] sm:$0x1]  }
  0x34   :  { %141 = vrot.lane.b32.xlu0 %v477_v23, %s606_s13  ;;  %s644_s13 = smov 10   ;;  %v519_v23 = vld [vmem:[%s871_s0 + $0x1] sm:$0x1]   ;;  %s648_s0 = smov 6  }
  0x3a   :  { %167 = vrot.lane.b32.xlu1 %v481_v25, %s608_s19  ;;  %s637_s19 = smov 26  }
  0x3b   :  { %174 = vrot.lane.b32.xlu2 %v482_v27, %s610_s23  ;;  %s619_s23 = smov 62  }
  0x3c   :  { %161 = vrot.lane.b32.xlu0 %v480_v26, %s609_s22  ;;  %s647_s22 = smov 4  }
  0x42   :  { %187 = vrot.lane.b32.xlu1 %v484_v28, %s611_s28  ;;  %s620_s28 = smov 58  }
  0x43   :  { %194 = vrot.lane.b32.xlu2 %v485_v30, %s613_s3  ;;  %s622_s3 = smov 56  }
  0x44   :  { %181 = vrot.lane.b32.xlu0 %v483_v29, %s612_s2  ;;  %s621_s2 = smov 60  }
  0x4a   :  { %207 = vrot.lane.b32.xlu1 %v487_v31, %s614_s8  ;;  %s623_s8 = smov 52  }
  0x4b   :  { %214 = vrot.lane.b32.xlu2 %v488_v33, %s616_s12  ;;  %s625_s12 = smov 50  }
  0x4c   :  { %201 = vrot.lane.b32.xlu0 %v486_v32, %s615_s11  ;;  %s624_s11 = smov 54  }
  0x52   :  { %227 = vrot.lane.b32.xlu1 %v490_v34, %s617_s17  ;;  %s626_s17 = smov 46  }
  0x53   :  { %234 = vrot.lane.b32.xlu2 %v491_v36, %s619_s23 }
  0x54   :  { %221 = vrot.lane.b32.xlu0 %v489_v35, %s618_s20  ;;  %s627_s20 = smov 48  }
  0x5a   :  { %247 = vrot.lane.b32.xlu1 %v493_v38, %s620_s28  ;;  %s640_s28 = smov 20  }
  0x5b   :  { %254 = vrot.lane.b32.xlu2 %v494_v40, %s622_s3 }
  0x5c   :  { %241 = vrot.lane.b32.xlu0 %v492_v39, %s621_s2 }
  0x5d   :  { %v48_v42 = vpop.permute.xlu2 %47  }
  0x62   :  { %267 = vrot.lane.b32.xlu1 %v496_v41, %s623_s8  ;;  %s643_s8 = smov 14  }
  0x63   :  { %274 = vrot.lane.b32.xlu2 %v497_v44, %s625_s12 }
  0x64   :  { %261 = vrot.lane.b32.xlu0 %v495_v43, %s624_s11 }
  0x65   :  { %v55_v46 = vpop.permute.xlu2 %54  }
  0x6a   :  { %287 = vrot.lane.b32.xlu1 %v499_v45, %s626_s17  ;;  %s646_s17 = smov 8  }
  0x6b   :  { %294 = vrot.lane.b32.xlu2 %v500_v48, %s628_s21 }
  0x6c   :  { %281 = vrot.lane.b32.xlu0 %v498_v47, %s627_s20 }
  0x6d   :  { %v75_v50 = vpop.permute.xlu2 %74  }
  0x72   :  { %307 = vrot.lane.b32.xlu1 %v502_v49, %s629_s26 }
  0x73   :  { %314 = vrot.lane.b32.xlu2 %v503_v52, %s631_s30 }
  0x74   :  { %301 = vrot.lane.b32.xlu0 %v501_v51, %s630_s29  ;;  %v35_v53 = vpop.permute.xlu1 %34  }
  0x75   :  { %v95_v56 = vpop.permute.xlu2 %94  }
  0x76   :  { %v12_v54 = vpop.permute.xlu0 %11  }
  0x77   :  { %15 = vst.msk [vmem:[#allocation0 + $0x8] sm:$0x1] %vm13_vm1, %v12_v54   ;;  %vm156_vm1 = vcmask 753328  }
  0x78   :  { %17 = vst.msk [vmem:[#allocation0] sm:$0x1] %vm16_vm3, %v12_v54   ;;  %vm103_vm3 = vcmask 884528  }
  0x7a   :  { %327 = vrot.lane.b32.xlu1 %v505_v55, %s632_s6 }
  0x7b   :  { %334 = vrot.lane.b32.xlu2 %v506_v58, %s634_s10 }
  0x7c   :  { %321 = vrot.lane.b32.xlu0 %v504_v57, %s633_s9  ;;  %v42_v59 = vpop.permute.xlu1 %41  }
  0x7d   :  { %44 = vst.msk [vmem:[#allocation0] sm:$0x1] %vm43_vm4, %v42_v59   ;;  %v115_v62 = vpop.permute.xlu2 %114   ;;  %vm176_vm4 = vcmask 704128  }
  0x7e   :  { %v25_v60 = vpop.permute.xlu0 %24  }
  0x7f   :  { %28 = vst.msk [vmem:[#allocation0 + $0x10] sm:$0x1] %vm9_vm0, %v25_v60   ;;  %vm83_vm0 = vcmask 933728  }
  0x80   :  { %31 = vst.msk [vmem:[#allocation0 + $0x8] sm:$0x1] %vm29_vm5, %v25_v60   ;;  %vm129_vm5 = vcmask 818928  }
  0x81   :  { %38 = vst.msk [vmem:[#allocation0 + $0x10] sm:$0x1] %vm36_vm6, %v35_v53   ;;  %vm123_vm6 = vcmask 835328  }
  0x82   :  { %51 = vst.msk [vmem:[#allocation0 + $0x8] sm:$0x1] %vm49_vm7, %v48_v42   ;;  %347 = vrot.lane.b32.xlu1 %v508_v61, %s635_s15  ;;  %vm196_vm7 = vcmask 654928  }
  0x83   :  { %58 = vst.msk [vmem:[#allocation0 + $0x10] sm:$0x1] %vm56_vm8, %v55_v46   ;;  %354 = vrot.lane.b32.xlu2 %v509_v0, %s637_s19  ;;  %vm149_vm8 = vcmask 769728  }
  0x84   :  { %341 = vrot.lane.b32.xlu0 %v507_v63, %s636_s18  ;;  %78 = vst.msk [vmem:[#allocation0 + $0x10] sm:$0x1] %vm76_vm9, %v75_v50   ;;  %v68_v1 = vpop.permute.xlu1 %67   ;;  %vm143_vm9 = vcmask 786128  }
  0x85   :  { %71 = vst.msk [vmem:[#allocation0 + $0x8] sm:$0x1] %vm69_vm10, %v68_v1   ;;  %v135_v4 = vpop.permute.xlu2 %134   ;;  %vm216_vm10 = vcmask 605728  }
  0x86   :  { %v62_v2 = vpop.permute.xlu0 %61   ;;  %98 = vst.msk [vmem:[#allocation0 + $0x10] sm:$0x1] %vm96_vm11, %v95_v56   ;;  %vm169_vm11 = vcmask 720528  }
  0x87   :  { %64 = vst.msk [vmem:[#allocation0] sm:$0x1] %vm63_vm12, %v62_v2   ;;  %vm163_vm12 = vcmask 736928  }
  0x88   :  { %118 = vst.msk [vmem:[#allocation0 + $0x10] sm:$0x1] %vm116_vm13, %v115_v62   ;;  %vm236_vm13 = vcmask 556528  }
  0x89   :  { %138 = vst.msk [vmem:[#allocation0 + $0x10] sm:$0x1] %vm136_vm14, %v135_v4   ;;  %vm189_vm14 = vcmask 671328  }
  0x8a   :  { %367 = vrot.lane.b32.xlu1 %v511_v3, %s638_s24 }
  0x8b   :  { %374 = vrot.lane.b32.xlu2 %v512_v6, %s640_s28 }
  0x8c   :  { %361 = vrot.lane.b32.xlu0 %v510_v5, %s639_s27  ;;  %v88_v7 = vpop.permute.xlu1 %87  }
  0x8d   :  { %91 = vst.msk [vmem:[#allocation0 + $0x8] sm:$0x1] %vm89_vm15, %v88_v7   ;;  %v155_v10 = vpop.permute.xlu2 %154   ;;  %vm183_vm15 = vcmask 687728  }
  0x8e   :  { %v82_v8 = vpop.permute.xlu0 %81   ;;  %158 = vst.msk [vmem:[#allocation0 + $0x10] sm:$0x1] %vm156_vm1, %v155_v10   ;;  %vm209_vm1 = vcmask 622128  }
  0x8f   :  { %84 = vst.msk [vmem:[#allocation0] sm:$0x1] %vm83_vm0, %v82_v8   ;;  %vm256_vm0 = vcmask 507328  }
  0x92   :  { %387 = vrot.lane.b32.xlu1 %v514_v9, %s641_s4 }
  0x93   :  { %394 = vrot.lane.b32.xlu2 %v515_v12, %s643_s8 }
  0x94   :  { %381 = vrot.lane.b32.xlu0 %v513_v11, %s642_s7  ;;  %v108_v13 = vpop.permute.xlu1 %107  }
  0x95   :  { %111 = vst.msk [vmem:[#allocation0 + $0x8] sm:$0x1] %vm109_vm2, %v108_v13   ;;  %v175_v16 = vpop.permute.xlu2 %174   ;;  %vm203_vm2 = vcmask 638528  }
  0x96   :  { %v102_v14 = vpop.permute.xlu0 %101   ;;  %178 = vst.msk [vmem:[#allocation0 + $0x10] sm:$0x1] %vm176_vm4, %v175_v16   ;;  %vm229_vm4 = vcmask 572928  }
  0x97   :  { %104 = vst.msk [vmem:[#allocation0] sm:$0x1] %vm103_vm3, %v102_v14   ;;  %vm276_vm3 = vcmask 458128  }
  0x9a   :  { %407 = vrot.lane.b32.xlu1 %v517_v15, %s644_s13 }
  0x9b   :  { %414 = vrot.lane.b32.xlu2 %v518_v18, %s646_s17 }
  0x9c   :  { %401 = vrot.lane.b32.xlu0 %v516_v17, %s645_s16  ;;  %v128_v19 = vpop.permute.xlu1 %127  }
  0x9d   :  { %131 = vst.msk [vmem:[#allocation0 + $0x8] sm:$0x1] %vm129_vm5, %v128_v19   ;;  %v195_v22 = vpop.permute.xlu2 %194   ;;  %vm223_vm5 = vcmask 589328  }
  0x9e   :  { %v122_v20 = vpop.permute.xlu0 %121   ;;  %198 = vst.msk [vmem:[#allocation0 + $0x10] sm:$0x1] %vm196_vm7, %v195_v22   ;;  %vm249_vm7 = vcmask 523728  }
  0x9f   :  { %124 = vst.msk [vmem:[#allocation0] sm:$0x1] %vm123_vm6, %v122_v20   ;;  %vm296_vm6 = vcmask 408928  }
  0xa2   :  { %427 = vrot.lane.b32.xlu1 %v520_v21, %s647_s22 }
  0xa3   :  { %434 = vrot.lane.b32.xlu2 %v521_v24, %s649_s25 }
  0xa4   :  { %421 = vrot.lane.b32.xlu0 %v519_v23, %s648_s0  ;;  %v148_v25 = vpop.permute.xlu1 %147  }
  0xa5   :  { %151 = vst.msk [vmem:[#allocation0 + $0x8] sm:$0x1] %vm149_vm8, %v148_v25   ;;  %v215_v27 = vpop.permute.xlu2 %214   ;;  %vm243_vm8 = vcmask 540128  }
  0xa6   :  { %v142_v26 = vpop.permute.xlu0 %141   ;;  %218 = vst.msk [vmem:[#allocation0 + $0x10] sm:$0x1] %vm216_vm10, %v215_v27   ;;  %vm269_vm10 = vcmask 474528  }
  0xa7   :  { %144 = vst.msk [vmem:[#allocation0] sm:$0x1] %vm143_vm9, %v142_v26   ;;  %vm316_vm9 = vcmask 359728  }
  0xac   :  { %v168_v28 = vpop.permute.xlu1 %167  }
  0xad   :  { %171 = vst.msk [vmem:[#allocation0 + $0x8] sm:$0x1] %vm169_vm11, %v168_v28   ;;  %v235_v30 = vpop.permute.xlu2 %234   ;;  %vm263_vm11 = vcmask 490928  }
  0xae   :  { %v162_v29 = vpop.permute.xlu0 %161   ;;  %238 = vst.msk [vmem:[#allocation0 + $0x10] sm:$0x1] %vm236_vm13, %v235_v30   ;;  %vm289_vm13 = vcmask 425328  }
  0xaf   :  { %164 = vst.msk [vmem:[#allocation0] sm:$0x1] %vm163_vm12, %v162_v29   ;;  %vm336_vm12 = vcmask 310528  }
  0xb4   :  { %v188_v31 = vpop.permute.xlu1 %187  }
  0xb5   :  { %191 = vst.msk [vmem:[#allocation0 + $0x8] sm:$0x1] %vm189_vm14, %v188_v31   ;;  %v255_v33 = vpop.permute.xlu2 %254   ;;  %vm283_vm14 = vcmask 441728  }
  0xb6   :  { %v182_v32 = vpop.permute.xlu0 %181   ;;  %258 = vst.msk [vmem:[#allocation0 + $0x10] sm:$0x1] %vm256_vm0, %v255_v33   ;;  %vm309_vm0 = vcmask 376128  }
  0xb7   :  { %184 = vst.msk [vmem:[#allocation0] sm:$0x1] %vm183_vm15, %v182_v32   ;;  %vm356_vm15 = vcmask 261328  }
  0xbc   :  { %v208_v34 = vpop.permute.xlu1 %207  }
  0xbd   :  { %211 = vst.msk [vmem:[#allocation0 + $0x8] sm:$0x1] %vm209_vm1, %v208_v34   ;;  %v275_v36 = vpop.permute.xlu2 %274   ;;  %vm303_vm1 = vcmask 392528  }
  0xbe   :  { %v202_v35 = vpop.permute.xlu0 %201   ;;  %278 = vst.msk [vmem:[#allocation0 + $0x10] sm:$0x1] %vm276_vm3, %v275_v36   ;;  %vm329_vm3 = vcmask 326928  }
  0xbf   :  { %204 = vst.msk [vmem:[#allocation0] sm:$0x1] %vm203_vm2, %v202_v35   ;;  %vm376_vm2 = vcmask 212128  }
  0xc4   :  { %v228_v37 = vpop.permute.xlu1 %227  }
  0xc5   :  { %231 = vst.msk [vmem:[#allocation0 + $0x8] sm:$0x1] %vm229_vm4, %v228_v37   ;;  %v295_v39 = vpop.permute.xlu2 %294   ;;  %vm323_vm4 = vcmask 343328  }
  0xc6   :  { %v222_v38 = vpop.permute.xlu0 %221   ;;  %298 = vst.msk [vmem:[#allocation0 + $0x10] sm:$0x1] %vm296_vm6, %v295_v39   ;;  %vm349_vm6 = vcmask 277728  }
  0xc7   :  { %224 = vst.msk [vmem:[#allocation0] sm:$0x1] %vm223_vm5, %v222_v38   ;;  %vm396_vm5 = vcmask 162928  }
  0xcc   :  { %v248_v40 = vpop.permute.xlu1 %247  }
  0xcd   :  { %251 = vst.msk [vmem:[#allocation0 + $0x8] sm:$0x1] %vm249_vm7, %v248_v40   ;;  %v315_v42 = vpop.permute.xlu2 %314   ;;  %vm343_vm7 = vcmask 294128  }
  0xce   :  { %v242_v41 = vpop.permute.xlu0 %241   ;;  %318 = vst.msk [vmem:[#allocation0 + $0x10] sm:$0x1] %vm316_vm9, %v315_v42   ;;  %vm369_vm9 = vcmask 228528  }
  0xcf   :  { %244 = vst.msk [vmem:[#allocation0] sm:$0x1] %vm243_vm8, %v242_v41   ;;  %vm416_vm8 = vcmask 113728  }
  0xd4   :  { %v268_v43 = vpop.permute.xlu1 %267  }
  0xd5   :  { %271 = vst.msk [vmem:[#allocation0 + $0x8] sm:$0x1] %vm269_vm10, %v268_v43   ;;  %v335_v45 = vpop.permute.xlu2 %334   ;;  %vm363_vm10 = vcmask 244928  }
  0xd6   :  { %v262_v44 = vpop.permute.xlu0 %261   ;;  %338 = vst.msk [vmem:[#allocation0 + $0x10] sm:$0x1] %vm336_vm12, %v335_v45   ;;  %vm389_vm12 = vcmask 179328  }
  0xd7   :  { %264 = vst.msk [vmem:[#allocation0] sm:$0x1] %vm263_vm11, %v262_v44   ;;  %vm436_vm11 = vcmask 64528  }
  0xdc   :  { %v288_v46 = vpop.permute.xlu1 %287  }
  0xdd   :  { %291 = vst.msk [vmem:[#allocation0 + $0x8] sm:$0x1] %vm289_vm13, %v288_v46   ;;  %v355_v48 = vpop.permute.xlu2 %354   ;;  %vm383_vm13 = vcmask 195728  }
  0xde   :  { %v282_v47 = vpop.permute.xlu0 %281   ;;  %358 = vst.msk [vmem:[#allocation0 + $0x10] sm:$0x1] %vm356_vm15, %v355_v48   ;;  %vm403_vm15 = vcmask 146528  }
  0xdf   :  { %284 = vst.msk [vmem:[#allocation0] sm:$0x1] %vm283_vm14, %v282_v47   ;;  %vm409_vm14 = vcmask 130128  }
  0xe4   :  { %v308_v49 = vpop.permute.xlu1 %307  }
  0xe5   :  { %311 = vst.msk [vmem:[#allocation0 + $0x8] sm:$0x1] %vm309_vm0, %v308_v49   ;;  %v375_v51 = vpop.permute.xlu2 %374   ;;  %vm429_vm0 = vcmask 80928  }
  0xe6   :  { %v302_v50 = vpop.permute.xlu0 %301   ;;  %378 = vst.msk [vmem:[#allocation0 + $0x10] sm:$0x1] %vm376_vm2, %v375_v51  }
  0xe7   :  { %304 = vst.msk [vmem:[#allocation0] sm:$0x1] %vm303_vm1, %v302_v50   ;;  %vm423_vm1 = vcmask 97328  }
  0xec   :  { %v328_v52 = vpop.permute.xlu1 %327  }
  0xed   :  { %331 = vst.msk [vmem:[#allocation0 + $0x8] sm:$0x1] %vm329_vm3, %v328_v52   ;;  %v395_v54 = vpop.permute.xlu2 %394  }
  0xee   :  { %v322_v53 = vpop.permute.xlu0 %321   ;;  %398 = vst.msk [vmem:[#allocation0 + $0x10] sm:$0x1] %vm396_vm5, %v395_v54  }
  0xef   :  { %324 = vst.msk [vmem:[#allocation0] sm:$0x1] %vm323_vm4, %v322_v53  }
  0xf4   :  { %v348_v55 = vpop.permute.xlu1 %347  }
  0xf5   :  { %351 = vst.msk [vmem:[#allocation0 + $0x8] sm:$0x1] %vm349_vm6, %v348_v55   ;;  %v415_v57 = vpop.permute.xlu2 %414  }
  0xf6   :  { %v342_v56 = vpop.permute.xlu0 %341   ;;  %418 = vst.msk [vmem:[#allocation0 + $0x10] sm:$0x1] %vm416_vm8, %v415_v57  }
  0xf7   :  { %344 = vst.msk [vmem:[#allocation0] sm:$0x1] %vm343_vm7, %v342_v56  }
  0xfc   :  { %v368_v58 = vpop.permute.xlu1 %367  }
  0xfd   :  { %371 = vst.msk [vmem:[#allocation0 + $0x8] sm:$0x1] %vm369_vm9, %v368_v58   ;;  %v435_v60 = vpop.permute.xlu2 %434  }
  0xfe   :  { %v362_v59 = vpop.permute.xlu0 %361   ;;  %438 = vst.msk [vmem:[#allocation0 + $0x10] sm:$0x1] %vm436_vm11, %v435_v60  }
  0xff   :  { %364 = vst.msk [vmem:[#allocation0] sm:$0x1] %vm363_vm10, %v362_v59  }
 0x104   :  { %v388_v61 = vpop.permute.xlu1 %387  }
 0x105   :  { %391 = vst.msk [vmem:[#allocation0 + $0x8] sm:$0x1] %vm389_vm12, %v388_v61   ;;  %v452_v63 = vld [vmem:[#allocation0 + $0x10] sm:$0x1] }
 0x106   :  { %v382_v62 = vpop.permute.xlu0 %381   ;;  %523 = vst [vmem:[%s872_s1 + $0x2] sm:$0x1] %v452_v63 }
 0x107   :  { %384 = vst.msk [vmem:[#allocation0] sm:$0x1] %vm383_vm13, %v382_v62  }
 0x10c   :  { %v408_v0 = vpop.permute.xlu1 %407  }
 0x10d   :  { %411 = vst.msk [vmem:[#allocation0 + $0x8] sm:$0x1] %vm409_vm14, %v408_v0  }
 0x10e   :  { %v402_v1 = vpop.permute.xlu0 %401  }
 0x10f   :  { %404 = vst.msk [vmem:[#allocation0] sm:$0x1] %vm403_vm15, %v402_v1  }
 0x114   :  { %v428_v2 = vpop.permute.xlu1 %427  }
 0x115   :  { %431 = vst.msk [vmem:[#allocation0 + $0x8] sm:$0x1] %vm429_vm0, %v428_v2  }
 0x116   :  { %v422_v3 = vpop.permute.xlu0 %421  }
 0x117   :  { %424 = vst.msk [vmem:[#allocation0] sm:$0x1] %vm423_vm1, %v422_v3  }
 0x11c   :  { %v446_v4 = vld [vmem:[#allocation0 + $0x8] sm:$0x1] }
 0x11d   :  { %522 = vst [vmem:[%s872_s1 + $0x1] sm:$0x1] %v446_v4 }
 0x11e   :  { %v441_v5 = vld [vmem:[#allocation0] sm:$0x1] }
 0x11f   :  { %444 = vst [vmem:[%s872_s1] sm:$0x1] %v441_v5 }

// kernel: transition_forward.1
= control target key start
LH: loop header
LB: loop body
LE: loop exit
PB: predicated region body
PF: predicated region fallthrough
CT: control target
= control target key end

     0   :  { %s1298_s21 = smov 0   ;;  %s2550_s0 = inlined_call_operand.vmem [shape: f32[16,384], index: 0, kind: input, shape index: {}]   ;;  %s2551_s1 = inlined_call_operand.vmem [shape: f32[16,256], index: 1, kind: input, shape index: {}]   ;;  %s2552_s2 = inlined_call_operand.vmem [shape: f32[384,384], index: 2, kind: input, shape index: {}]   ;;  %s2553_s3 = inlined_call_operand.vmem [shape: f32[384,384], index: 3, kind: input, shape index: {}]   ;;  %s2554_s4 = inlined_call_operand.vmem [shape: f32[256,384], index: 4, kind: input, shape index: {}]   ;;  %s2555_s5 = inlined_call_operand.vmem [shape: f32[1,384], index: 5, kind: input, shape index: {}]   ;;  %s2556_s6 = inlined_call_operand.vmem [shape: f32[16,384], index: 6, kind: output, shape index: {}]  }
   0x1 LB: > { %s1231_s22 = sadd.s32 4294967295, %s1261_s21   ;;  %p1235_p0 = scmp.ge.s32.totalorder %s1261_s21, 1  ;;  %s1261_s21 = sphi %s1298_s21, %s16_s21  }
   0x2   : > { %p222_p1 = scmp.lt.s32.totalorder %s1261_s21, 3 }
   0x4   : > { %p223_p2 = pnand %p1235_p0, %p222_p1 }
   0x5   : > { %p1572_p3 = scmp.lt.s32.totalorder (!%p223_p2), %s1231_s22, 1 }
   0x6   : > { %226 = sbr.rel (%p223_p2) target bundleno = 357 (0x165), region = 44 }
   0xb   : > { %v469_v0 = vld [vmem:[%s2553_s3 + $0x168] sm:$0xff]  ;;  %v470_v3 = vld [vmem:[%s2553_s3 + $0x170] sm:$0xff]  ;;  %v467_v7 = vld [vmem:[%s2553_s3 + $0x158] sm:$0xff]  ;;  %s2559_s22 = smov (!%p1572_p3, %s1231_s22), 1 }
   0xc   : > { %v517_v1 = vld [vmem:[%s2553_s3 + $0x2e8] sm:$0xff]  ;;  %568 = vmatpush.msra.mxu0 %v469_v0  ;;  %v466_v4 = vld [vmem:[%s2553_s3 + $0x150] sm:$0xff]  ;;  %628 = vmatpush.msra.mxu3 %v470_v3  ;;  %v463_v8 = vld [vmem:[%s2553_s3 + $0x138] sm:$0xff]  ;;  %s1243_s10 = smul.u32 24, %s2559_s22  ;;  %s1242_s27 = sshll.u32 %s2559_s22, 4 }
   0xd   : > { %v565_v2 = vld [vmem:[%s2553_s3 + $0x468] sm:$0xff]  ;;  %588 = vmatpush.msra.mxu1 %v517_v1  ;;  %v514_v5 = vld [vmem:[%s2553_s3 + $0x2d0] sm:$0xff]  ;;  %v511_v9 = vld [vmem:[%s2553_s3 + $0x2b8] sm:$0xff]  ;;  %s266_s20 = scalar_lea.vmem %s2551_s1, %s1242_s27 }
   0xe   : > { %608 = vmatpush.msra.mxu2 %v565_v2  ;;  %v562_v6 = vld [vmem:[%s2553_s3 + $0x450] sm:$0xff]  ;;  %569 = vmatpush.msra.mxu0 %v466_v4  ;;  %v559_v10 = vld [vmem:[%s2553_s3 + $0x438] sm:$0xff]  ;;  %v464_v11 = vld [vmem:[%s2553_s3 + $0x140] sm:$0xff]  ;;  %s1660_s7 = scalar_lea.vmem %s2550_s0, %s1243_s10  ;;  %s2540_s24 = scalar_lea.vmem %s2556_s6, %s1243_s10 }
   0xf   : > { %589 = vmatpush.msra.mxu1 %v514_v5  ;;  %629 = vmatpush.msra.mxu3 %v467_v7  ;;  %v460_v12 = vld [vmem:[%s2553_s3 + $0x120] sm:$0xff]  ;;  %v461_v15 = vld [vmem:[%s2553_s3 + $0x128] sm:$0xff]  ;;  %v458_v19 = vld [vmem:[%s2553_s3 + $0x110] sm:$0xff] }
  0x10   : > { %609 = vmatpush.msra.mxu2 %v562_v6  ;;  %v508_v13 = vld [vmem:[%s2553_s3 + $0x2a0] sm:$0xff]  ;;  %570 = vmatpush.msra.mxu0 %v463_v8  ;;  %v457_v16 = vld [vmem:[%s2553_s3 + $0x108] sm:$0xff]  ;;  %v454_v20 = vld [vmem:[%s2553_s3 + $0xf0] sm:$0xff] }
  0x11   : > { %590 = vmatpush.msra.mxu1 %v511_v9  ;;  %v556_v14 = vld [vmem:[%s2553_s3 + $0x420] sm:$0xff]  ;;  %630 = vmatpush.msra.mxu3 %v464_v11  ;;  %v505_v17 = vld [vmem:[%s2553_s3 + $0x288] sm:$0xff]  ;;  %v502_v21 = vld [vmem:[%s2553_s3 + $0x270] sm:$0xff] }
  0x12   : > { %610 = vmatpush.msra.mxu2 %v559_v10  ;;  %571 = vmatpush.msra.mxu0 %v460_v12  ;;  %v553_v18 = vld [vmem:[%s2553_s3 + $0x408] sm:$0xff]  ;;  %v550_v22 = vld [vmem:[%s2553_s3 + $0x3f0] sm:$0xff]  ;;  %v455_v23 = vld [vmem:[%s2553_s3 + $0xf8] sm:$0xff] }
  0x13   : > { %591 = vmatpush.msra.mxu1 %v508_v13  ;;  %631 = vmatpush.msra.mxu3 %v461_v15  ;;  %v451_v24 = vld [vmem:[%s2553_s3 + $0xd8] sm:$0xff]  ;;  %v452_v27 = vld [vmem:[%s2553_s3 + $0xe0] sm:$0xff]  ;;  %v449_v31 = vld [vmem:[%s2553_s3 + $0xc8] sm:$0xff] }
  0x14   : > { %611 = vmatpush.msra.mxu2 %v556_v14  ;;  %572 = vmatpush.msra.mxu0 %v457_v16  ;;  %v499_v25 = vld [vmem:[%s2553_s3 + $0x258] sm:$0xff]  ;;  %v448_v28 = vld [vmem:[%s2553_s3 + $0xc0] sm:$0xff]  ;;  %v445_v32 = vld [vmem:[%s2553_s3 + $0xa8] sm:$0xff] }
  0x15   : > { %592 = vmatpush.msra.mxu1 %v505_v17  ;;  %632 = vmatpush.msra.mxu3 %v458_v19  ;;  %v547_v26 = vld [vmem:[%s2553_s3 + $0x3d8] sm:$0xff]  ;;  %v496_v29 = vld [vmem:[%s2553_s3 + $0x240] sm:$0xff]  ;;  %v493_v33 = vld [vmem:[%s2553_s3 + $0x228] sm:$0xff] }
  0x16   : > { %612 = vmatpush.msra.mxu2 %v553_v18  ;;  %573 = vmatpush.msra.mxu0 %v454_v20  ;;  %v544_v30 = vld [vmem:[%s2553_s3 + $0x3c0] sm:$0xff]  ;;  %v541_v34 = vld [vmem:[%s2553_s3 + $0x3a8] sm:$0xff]  ;;  %v446_v35 = vld [vmem:[%s2553_s3 + $0xb0] sm:$0xff] }
  0x17   : > { %593 = vmatpush.msra.mxu1 %v502_v21  ;;  %633 = vmatpush.msra.mxu3 %v455_v23  ;;  %v442_v36 = vld [vmem:[%s2553_s3 + $0x90] sm:$0xff]  ;;  %v443_v39 = vld [vmem:[%s2553_s3 + $0x98] sm:$0xff]  ;;  %v440_v43 = vld [vmem:[%s2553_s3 + $0x80] sm:$0xff] }
  0x18   : > { %613 = vmatpush.msra.mxu2 %v550_v22  ;;  %574 = vmatpush.msra.mxu0 %v451_v24  ;;  %v490_v37 = vld [vmem:[%s2553_s3 + $0x210] sm:$0xff]  ;;  %v439_v40 = vld [vmem:[%s2553_s3 + $0x78] sm:$0xff]  ;;  %v436_v44 = vld [vmem:[%s2553_s3 + $0x60] sm:$0xff] }
  0x19   : > { %594 = vmatpush.msra.mxu1 %v499_v25  ;;  %634 = vmatpush.msra.mxu3 %v452_v27  ;;  %v538_v38 = vld [vmem:[%s2553_s3 + $0x390] sm:$0xff]  ;;  %v487_v41 = vld [vmem:[%s2553_s3 + $0x1f8] sm:$0xff]  ;;  %v484_v45 = vld [vmem:[%s2553_s3 + $0x1e0] sm:$0xff] }
  0x1a   : > { %614 = vmatpush.msra.mxu2 %v547_v26  ;;  %575 = vmatpush.msra.mxu0 %v448_v28  ;;  %v535_v42 = vld [vmem:[%s2553_s3 + $0x378] sm:$0xff]  ;;  %v532_v46 = vld [vmem:[%s2553_s3 + $0x360] sm:$0xff]  ;;  %v437_v47 = vld [vmem:[%s2553_s3 + $0x68] sm:$0xff] }
  0x1b   : > { %595 = vmatpush.msra.mxu1 %v496_v29  ;;  %635 = vmatpush.msra.mxu3 %v449_v31  ;;  %v433_v48 = vld [vmem:[%s2553_s3 + $0x48] sm:$0xff]  ;;  %v434_v51 = vld [vmem:[%s2553_s3 + $0x50] sm:$0xff]  ;;  %v431_v55 = vld [vmem:[%s2553_s3 + $0x38] sm:$0xff] }
  0x1c   : > { %615 = vmatpush.msra.mxu2 %v544_v30  ;;  %576 = vmatpush.msra.mxu0 %v445_v32  ;;  %v481_v49 = vld [vmem:[%s2553_s3 + $0x1c8] sm:$0xff]  ;;  %v430_v52 = vld [vmem:[%s2553_s3 + $0x30] sm:$0xff]  ;;  %v427_v56 = vld [vmem:[%s2553_s3 + $0x18] sm:$0xff] }
  0x1d   : > { %596 = vmatpush.msra.mxu1 %v493_v33  ;;  %636 = vmatpush.msra.mxu3 %v446_v35  ;;  %v529_v50 = vld [vmem:[%s2553_s3 + $0x348] sm:$0xff]  ;;  %v478_v53 = vld [vmem:[%s2553_s3 + $0x1b0] sm:$0xff]  ;;  %v475_v57 = vld [vmem:[%s2553_s3 + $0x198] sm:$0xff] }
  0x1e   : > { %616 = vmatpush.msra.mxu2 %v541_v34  ;;  %577 = vmatpush.msra.mxu0 %v442_v36  ;;  %v526_v54 = vld [vmem:[%s2553_s3 + $0x330] sm:$0xff]  ;;  %v523_v58 = vld [vmem:[%s2553_s3 + $0x318] sm:$0xff]  ;;  %v428_v59 = vld [vmem:[%s2553_s3 + $0x20] sm:$0xff] }
  0x1f   : > { %597 = vmatpush.msra.mxu1 %v490_v37  ;;  %637 = vmatpush.msra.mxu3 %v443_v39  ;;  %v424_v60 = vld [vmem:[%s2553_s3] sm:$0xff]  ;;  %v425_v63 = vld [vmem:[%s2553_s3 + $0x8] sm:$0xff]  ;;  %v518_v0 = vld [vmem:[%s2553_s3 + $0x2f0] sm:$0xff] }
  0x20   : > { %617 = vmatpush.msra.mxu2 %v538_v38  ;;  %578 = vmatpush.msra.mxu0 %v439_v40  ;;  %v472_v61 = vld [vmem:[%s2553_s3 + $0x180] sm:$0xff]  ;;  %v566_v1 = vld [vmem:[%s2553_s3 + $0x470] sm:$0xff]  ;;  %v471_v2 = vld [vmem:[%s2553_s3 + $0x178] sm:$0xff] }
  0x21   : > { %598 = vmatpush.msra.mxu1 %v487_v41  ;;  %638 = vmatpush.msra.mxu3 %v440_v43  ;;  %v520_v62 = vld [vmem:[%s2553_s3 + $0x300] sm:$0xff]  ;;  %v519_v3 = vld [vmem:[%s2553_s3 + $0x2f8] sm:$0xff]  ;;  %v465_v10 = vld [vmem:[%s2553_s3 + $0x148] sm:$0xff] }
  0x22   : > { %618 = vmatpush.msra.mxu2 %v535_v42  ;;  %579 = vmatpush.msra.mxu0 %v436_v44  ;;  %v515_v4 = vld [vmem:[%s2553_s3 + $0x2d8] sm:$0xff]  ;;  %v468_v6 = vld [vmem:[%s2553_s3 + $0x160] sm:$0xff]  ;;  %v513_v11 = vld [vmem:[%s2553_s3 + $0x2c8] sm:$0xff] }
  0x23   : > { %599 = vmatpush.msra.mxu1 %v484_v45  ;;  %639 = vmatpush.msra.mxu3 %v437_v47  ;;  %v563_v5 = vld [vmem:[%s2553_s3 + $0x458] sm:$0xff]  ;;  %v516_v7 = vld [vmem:[%s2553_s3 + $0x2e0] sm:$0xff]  ;;  %v509_v12 = vld [vmem:[%s2553_s3 + $0x2a8] sm:$0xff] }
  0x24   : > { %619 = vmatpush.msra.mxu2 %v532_v46  ;;  %580 = vmatpush.msra.mxu0 %v433_v48  ;;  %v512_v8 = vld [vmem:[%s2553_s3 + $0x2c0] sm:$0xff]  ;;  %v557_v13 = vld [vmem:[%s2553_s3 + $0x428] sm:$0xff]  ;;  %v462_v14 = vld [vmem:[%s2553_s3 + $0x130] sm:$0xff] }
  0x25   : > { %600 = vmatpush.msra.mxu1 %v481_v49  ;;  %640 = vmatpush.msra.mxu3 %v434_v51  ;;  %v560_v9 = vld [vmem:[%s2553_s3 + $0x440] sm:$0xff]  ;;  %v510_v15 = vld [vmem:[%s2553_s3 + $0x2b0] sm:$0xff]  ;;  %v459_v18 = vld [vmem:[%s2553_s3 + $0x118] sm:$0xff] }
  0x26   : > { %620 = vmatpush.msra.mxu2 %v529_v50  ;;  %581 = vmatpush.msra.mxu0 %v430_v52  ;;  %v506_v16 = vld [vmem:[%s2553_s3 + $0x290] sm:$0xff]  ;;  %v507_v19 = vld [vmem:[%s2553_s3 + $0x298] sm:$0xff]  ;;  %v456_v22 = vld [vmem:[%s2553_s3 + $0x100] sm:$0xff] }
  0x27   : > { %601 = vmatpush.msra.mxu1 %v478_v53  ;;  %641 = vmatpush.msra.mxu3 %v431_v55  ;;  %v554_v17 = vld [vmem:[%s2553_s3 + $0x410] sm:$0xff]  ;;  %v503_v20 = vld [vmem:[%s2553_s3 + $0x278] sm:$0xff]  ;;  %v504_v23 = vld [vmem:[%s2553_s3 + $0x280] sm:$0xff] }
  0x28   : > { %621 = vmatpush.msra.mxu2 %v526_v54  ;;  %582 = vmatpush.msra.mxu0 %v427_v56  ;;  %v551_v21 = vld [vmem:[%s2553_s3 + $0x3f8] sm:$0xff]  ;;  %v500_v24 = vld [vmem:[%s2553_s3 + $0x260] sm:$0xff]  ;;  %v453_v26 = vld [vmem:[%s2553_s3 + $0xe8] sm:$0xff] }
  0x29   : > { %602 = vmatpush.msra.mxu1 %v475_v57  ;;  %642 = vmatpush.msra.mxu3 %v428_v59  ;;  %v548_v25 = vld [vmem:[%s2553_s3 + $0x3e0] sm:$0xff]  ;;  %v501_v27 = vld [vmem:[%s2553_s3 + $0x268] sm:$0xff]  ;;  %v450_v30 = vld [vmem:[%s2553_s3 + $0xd0] sm:$0xff] }
  0x2a   : > { %622 = vmatpush.msra.mxu2 %v523_v58  ;;  %583 = vmatpush.msra.mxu0 %v424_v60  ;;  %v497_v28 = vld [vmem:[%s2553_s3 + $0x248] sm:$0xff]  ;;  %v498_v31 = vld [vmem:[%s2553_s3 + $0x250] sm:$0xff]  ;;  %v447_v34 = vld [vmem:[%s2553_s3 + $0xb8] sm:$0xff] }
  0x2b   : > { %603 = vmatpush.msra.mxu1 %v472_v61  ;;  %643 = vmatpush.msra.mxu3 %v425_v63  ;;  %v545_v29 = vld [vmem:[%s2553_s3 + $0x3c8] sm:$0xff]  ;;  %v494_v32 = vld [vmem:[%s2553_s3 + $0x230] sm:$0xff]  ;;  %v495_v35 = vld [vmem:[%s2553_s3 + $0x238] sm:$0xff] }
  0x2c   : > { %623 = vmatpush.msra.mxu2 %v520_v62  ;;  %648 = vmatpush.msrb.mxu0 %v518_v0  ;;  %v542_v33 = vld [vmem:[%s2553_s3 + $0x3b0] sm:$0xff]  ;;  %v491_v36 = vld [vmem:[%s2553_s3 + $0x218] sm:$0xff]  ;;  %v444_v38 = vld [vmem:[%s2553_s3 + $0xa0] sm:$0xff] }
  0x2d   : > { %668 = vmatpush.msrb.mxu1 %v566_v1  ;;  %708 = vmatpush.msrb.mxu3 %v519_v3  ;;  %v539_v37 = vld [vmem:[%s2553_s3 + $0x398] sm:$0xff]  ;;  %v492_v39 = vld [vmem:[%s2553_s3 + $0x220] sm:$0xff]  ;;  %v441_v42 = vld [vmem:[%s2553_s3 + $0x88] sm:$0xff] }
  0x2e   : > { %688 = vmatpush.msrb.mxu2 %v471_v2  ;;  %649 = vmatpush.msrb.mxu0 %v515_v4  ;;  %v488_v40 = vld [vmem:[%s2553_s3 + $0x200] sm:$0xff]  ;;  %v489_v43 = vld [vmem:[%s2553_s3 + $0x208] sm:$0xff]  ;;  %v438_v46 = vld [vmem:[%s2553_s3 + $0x70] sm:$0xff] }
  0x2f   : > { %669 = vmatpush.msrb.mxu1 %v563_v5  ;;  %709 = vmatpush.msrb.mxu3 %v516_v7  ;;  %v536_v41 = vld [vmem:[%s2553_s3 + $0x380] sm:$0xff]  ;;  %v485_v44 = vld [vmem:[%s2553_s3 + $0x1e8] sm:$0xff]  ;;  %v486_v47 = vld [vmem:[%s2553_s3 + $0x1f0] sm:$0xff] }
  0x30   : > { %689 = vmatpush.msrb.mxu2 %v468_v6  ;;  %650 = vmatpush.msrb.mxu0 %v512_v8  ;;  %v533_v45 = vld [vmem:[%s2553_s3 + $0x368] sm:$0xff]  ;;  %v482_v48 = vld [vmem:[%s2553_s3 + $0x1d0] sm:$0xff]  ;;  %v435_v50 = vld [vmem:[%s2553_s3 + $0x58] sm:$0xff] }
  0x31   : > { %670 = vmatpush.msrb.mxu1 %v560_v9  ;;  %710 = vmatpush.msrb.mxu3 %v513_v11  ;;  %v530_v49 = vld [vmem:[%s2553_s3 + $0x350] sm:$0xff]  ;;  %v483_v51 = vld [vmem:[%s2553_s3 + $0x1d8] sm:$0xff]  ;;  %v1681_v54 = vld [vmem:[%s1660_s7] sm:$0xff] }
  0x32   : > { %690 = vmatpush.msrb.mxu2 %v465_v10  ;;  %651 = vmatpush.msrb.mxu0 %v509_v12  ;;  %v479_v52 = vld [vmem:[%s2553_s3 + $0x1b8] sm:$0xff]  ;;  %v432_v55 = vld [vmem:[%s2553_s3 + $0x40] sm:$0xff]  ;;  %v1696_v59 = vld [vmem:[%s1660_s7 + $0x8] sm:$0xff]  ;;  %v1706_v62 = vmul.f32 %v1681_v54, %v1681_v54 }
  0x33   : > { %671 = vmatpush.msrb.mxu1 %v557_v13  ;;  %711 = vmatpush.msrb.mxu3 %v510_v15  ;;  %v527_v53 = vld [vmem:[%s2553_s3 + $0x338] sm:$0xff]  ;;  %v480_v56 = vld [vmem:[%s2553_s3 + $0x1c0] sm:$0xff]  ;;  %v429_v60 = vld [vmem:[%s2553_s3 + $0x28] sm:$0xff]  ;;  %v1722_v3 = vmul.f32 %v1696_v59, %v1696_v59 }
  0x34   : > { %691 = vmatpush.msrb.mxu2 %v462_v14  ;;  %652 = vmatpush.msrb.mxu0 %v506_v16  ;;  %v476_v57 = vld [vmem:[%s2553_s3 + $0x1a0] sm:$0xff]  ;;  %v477_v61 = vld [vmem:[%s2553_s3 + $0x1a8] sm:$0xff]  ;;  %v1709_v63 = vld [vmem:[%s1660_s7 + $0x10] sm:$0xff] }
  0x35   : > { %672 = vmatpush.msrb.mxu1 %v554_v17  ;;  %712 = vmatpush.msrb.mxu3 %v507_v19  ;;  %v524_v58 = vld [vmem:[%s2553_s3 + $0x320] sm:$0xff]  ;;  %v521_v0 = vld [vmem:[%s2553_s3 + $0x308] sm:$0xff]  ;;  %v426_v2 = vld [vmem:[%s2553_s3 + $0x10] sm:$0xff]  ;;  %v1729_v5 = vmul.f32 %v1709_v63, %v1709_v63 }
  0x36   : > { %692 = vmatpush.msrb.mxu2 %v459_v18  ;;  %653 = vmatpush.msrb.mxu0 %v503_v20  ;;  %v473_v1 = vld [vmem:[%s2553_s3 + $0x188] sm:$0xff]  ;;  %v474_v4 = vld [vmem:[%s2553_s3 + $0x190] sm:$0xff]  ;;  %v567_v6 = vld [vmem:[%s2553_s3 + $0x478] sm:$0xff] }
  0x37   : > { %673 = vmatpush.msrb.mxu1 %v551_v21  ;;  %713 = vmatpush.msrb.mxu3 %v504_v23  ;;  %v322_v7 = vld [vmem:[%s2552_s2 + $0x168] sm:$0xff]  ;;  %v564_v10 = vld [vmem:[%s2553_s3 + $0x460] sm:$0xff]  ;;  %v319_v11 = vld [vmem:[%s2552_s2 + $0x150] sm:$0xff] }
  0x38   : > { %693 = vmatpush.msrb.mxu2 %v456_v22  ;;  %654 = vmatpush.msrb.mxu0 %v500_v24  ;;  %v370_v8 = vld [vmem:[%s2552_s2 + $0x2e8] sm:$0xff]  ;;  %v367_v12 = vld [vmem:[%s2552_s2 + $0x2d0] sm:$0xff]  ;;  %v316_v15 = vld [vmem:[%s2552_s2 + $0x138] sm:$0xff] }
  0x39   : > { %674 = vmatpush.msrb.mxu1 %v548_v25  ;;  %714 = vmatpush.msrb.mxu3 %v501_v27  ;;  %v418_v9 = vld [vmem:[%s2552_s2 + $0x468] sm:$0xff]  ;;  %v415_v13 = vld [vmem:[%s2552_s2 + $0x450] sm:$0xff]  ;;  %v364_v16 = vld [vmem:[%s2552_s2 + $0x2b8] sm:$0xff] }
  0x3a   : > { %694 = vmatpush.msrb.mxu2 %v453_v26  ;;  %655 = vmatpush.msrb.mxu0 %v497_v28  ;;  %v561_v14 = vld [vmem:[%s2553_s3 + $0x448] sm:$0xff]  ;;  %v412_v17 = vld [vmem:[%s2552_s2 + $0x438] sm:$0xff]  ;;  %v313_v18 = vld [vmem:[%s2552_s2 + $0x120] sm:$0xff] }
  0x3b   : > { %675 = vmatpush.msrb.mxu1 %v545_v29  ;;  %715 = vmatpush.msrb.mxu3 %v498_v31  ;;  %v558_v19 = vld [vmem:[%s2553_s3 + $0x430] sm:$0xff]  ;;  %v361_v20 = vld [vmem:[%s2552_s2 + $0x2a0] sm:$0xff]  ;;  %v555_v22 = vld [vmem:[%s2553_s3 + $0x418] sm:$0xff] }
  0x3c   : > { %695 = vmatpush.msrb.mxu2 %v450_v30  ;;  %656 = vmatpush.msrb.mxu0 %v494_v32  ;;  %v409_v21 = vld [vmem:[%s2552_s2 + $0x420] sm:$0xff]  ;;  %v310_v23 = vld [vmem:[%s2552_s2 + $0x108] sm:$0xff]  ;;  %v307_v27 = vld [vmem:[%s2552_s2 + $0xf0] sm:$0xff] }
  0x3d   : > { %676 = vmatpush.msrb.mxu1 %v542_v33  ;;  %716 = vmatpush.msrb.mxu3 %v495_v35  ;;  %v358_v24 = vld [vmem:[%s2552_s2 + $0x288] sm:$0xff]  ;;  %v552_v26 = vld [vmem:[%s2553_s3 + $0x400] sm:$0xff]  ;;  %v355_v28 = vld [vmem:[%s2552_s2 + $0x270] sm:$0xff] }
  0x3e   : > { %696 = vmatpush.msrb.mxu2 %v447_v34  ;;  %657 = vmatpush.msrb.mxu0 %v491_v36  ;;  %v406_v25 = vld [vmem:[%s2552_s2 + $0x408] sm:$0xff]  ;;  %v403_v29 = vld [vmem:[%s2552_s2 + $0x3f0] sm:$0xff]  ;;  %v304_v31 = vld [vmem:[%s2552_s2 + $0xd8] sm:$0xff] }
  0x3f   : > { %677 = vmatpush.msrb.mxu1 %v539_v37  ;;  %717 = vmatpush.msrb.mxu3 %v492_v39  ;;  %v549_v30 = vld [vmem:[%s2553_s3 + $0x3e8] sm:$0xff]  ;;  %v352_v32 = vld [vmem:[%s2552_s2 + $0x258] sm:$0xff]  ;;  %v546_v34 = vld [vmem:[%s2553_s3 + $0x3d0] sm:$0xff] }
  0x40   : > { %697 = vmatpush.msrb.mxu2 %v444_v38  ;;  %658 = vmatpush.msrb.mxu0 %v488_v40  ;;  %v400_v33 = vld [vmem:[%s2552_s2 + $0x3d8] sm:$0xff]  ;;  %v301_v35 = vld [vmem:[%s2552_s2 + $0xc0] sm:$0xff]  ;;  %v298_v39 = vld [vmem:[%s2552_s2 + $0xa8] sm:$0xff] }
  0x41   : > { %678 = vmatpush.msrb.mxu1 %v536_v41  ;;  %718 = vmatpush.msrb.mxu3 %v489_v43  ;;  %v349_v36 = vld [vmem:[%s2552_s2 + $0x240] sm:$0xff]  ;;  %v543_v38 = vld [vmem:[%s2553_s3 + $0x3b8] sm:$0xff]  ;;  %v346_v40 = vld [vmem:[%s2552_s2 + $0x228] sm:$0xff] }
  0x42   : > { %698 = vmatpush.msrb.mxu2 %v441_v42  ;;  %659 = vmatpush.msrb.mxu0 %v485_v44  ;;  %v397_v37 = vld [vmem:[%s2552_s2 + $0x3c0] sm:$0xff]  ;;  %v394_v41 = vld [vmem:[%s2552_s2 + $0x3a8] sm:$0xff]  ;;  %v295_v43 = vld [vmem:[%s2552_s2 + $0x90] sm:$0xff] }
  0x43   : > { %679 = vmatpush.msrb.mxu1 %v533_v45  ;;  %719 = vmatpush.msrb.mxu3 %v486_v47  ;;  %v540_v42 = vld [vmem:[%s2553_s3 + $0x3a0] sm:$0xff]  ;;  %v343_v44 = vld [vmem:[%s2552_s2 + $0x210] sm:$0xff]  ;;  %v292_v47 = vld [vmem:[%s2552_s2 + $0x78] sm:$0xff] }
  0x44   : > { %699 = vmatpush.msrb.mxu2 %v438_v46  ;;  %660 = vmatpush.msrb.mxu0 %v482_v48  ;;  %v391_v45 = vld [vmem:[%s2552_s2 + $0x390] sm:$0xff]  ;;  %v537_v46 = vld [vmem:[%s2553_s3 + $0x388] sm:$0xff]  ;;  %v340_v48 = vld [vmem:[%s2552_s2 + $0x1f8] sm:$0xff] }
  0x45   : > { %680 = vmatpush.msrb.mxu1 %v530_v49  ;;  %720 = vmatpush.msrb.mxu3 %v483_v51  ;;  %v388_v49 = vld [vmem:[%s2552_s2 + $0x378] sm:$0xff]  ;;  %v289_v51 = vld [vmem:[%s2552_s2 + $0x60] sm:$0xff] }
  0x46   : > { %700 = vmatpush.msrb.mxu2 %v435_v50  ;;  %661 = vmatpush.msrb.mxu0 %v479_v52  ;;  %v534_v50 = vld [vmem:[%s2553_s3 + $0x370] sm:$0xff]  ;;  %v337_v52 = vld [vmem:[%s2552_s2 + $0x1e0] sm:$0xff] }
  0x47   : > { %681 = vmatpush.msrb.mxu1 %v527_v53  ;;  %721 = vmatpush.msrb.mxu3 %v480_v56  ;;  %v385_v53 = vld [vmem:[%s2552_s2 + $0x360] sm:$0xff]  ;;  %v286_v56 = vld [vmem:[%s2552_s2 + $0x48] sm:$0xff] }
  0x48   : > { %701 = vmatpush.msrb.mxu2 %v432_v55  ;;  %662 = vmatpush.msrb.mxu0 %v476_v57  ;;  %v531_v55 = vld [vmem:[%s2553_s3 + $0x358] sm:$0xff]  ;;  %v334_v57 = vld [vmem:[%s2552_s2 + $0x1c8] sm:$0xff] }
  0x49   : > { %682 = vmatpush.msrb.mxu1 %v524_v58  ;;  %722 = vmatpush.msrb.mxu3 %v477_v61  ;;  %v382_v58 = vld [vmem:[%s2552_s2 + $0x348] sm:$0xff]  ;;  %v283_v61 = vld [vmem:[%s2552_s2 + $0x30] sm:$0xff] }
  0x4a   : > { %702 = vmatpush.msrb.mxu2 %v429_v60  ;;  %584 = vmatmul.f32.vlgmr.msra.gmra.mxu0 %v1706_v62  ;;  %v528_v60 = vld [vmem:[%s2553_s3 + $0x340] sm:$0xff] }
  0x4b   : > { %683 = vmatpush.msrb.mxu1 %v521_v0  ;;  %663 = vmatpush.msrb.mxu0 %v473_v1  ;;  %v331_v0 = vld [vmem:[%s2552_s2 + $0x1b0] sm:$0xff] }
  0x4c   : > { %703 = vmatpush.msrb.mxu2 %v426_v2  ;;  %723 = vmatpush.msrb.mxu3 %v474_v4  ;;  %v379_v1 = vld [vmem:[%s2552_s2 + $0x330] sm:$0xff]  ;;  %v280_v2 = vld [vmem:[%s2552_s2 + $0x18] sm:$0xff] }
  0x4d   : > { %604 = vmatmul.f32.vlgmr.msra.gmra.mxu1 %v1722_v3  ;;  %624 = vmatmul.f32.vlgmr.msra.gmra.mxu2 %v1729_v5  ;;  %v328_v4 = vld [vmem:[%s2552_s2 + $0x198] sm:$0xff] }
  0x4e   : > { %644 = vmatmul.f32.vlgmr.msra.gmra.mxu3 %v1706_v62  ;;  %728 = vmatpush.msra.mxu0 %v567_v6  ;;  %v376_v6 = vld [vmem:[%s2552_s2 + $0x318] sm:$0xff] }
  0x4f   : > { %748 = vmatpush.msra.mxu1 %v322_v7  ;;  %768 = vmatpush.msra.mxu2 %v370_v8  ;;  %v522_v7 = vld [vmem:[%s2553_s3 + $0x310] sm:$0xff]  ;;  %v277_v8 = vld [vmem:[%s2552_s2] sm:$0xff] }
  0x50   : > { %788 = vmatpush.msra.mxu3 %v418_v9  ;;  %729 = vmatpush.msra.mxu0 %v564_v10  ;;  %v373_v9 = vld [vmem:[%s2552_s2 + $0x300] sm:$0xff]  ;;  %v323_v10 = vld [vmem:[%s2552_s2 + $0x170] sm:$0xff] }
  0x51   : > { %749 = vmatpush.msra.mxu1 %v319_v11  ;;  %769 = vmatpush.msra.mxu2 %v367_v12  ;;  %v371_v11 = vld [vmem:[%s2552_s2 + $0x2f0] sm:$0xff] }
  0x52   : > { %789 = vmatpush.msra.mxu3 %v415_v13  ;;  %730 = vmatpush.msra.mxu0 %v561_v14  ;;  %v419_v12 = vld [vmem:[%s2552_s2 + $0x470] sm:$0xff]  ;;  %v324_v13 = vld [vmem:[%s2552_s2 + $0x178] sm:$0xff] }
  0x53   : > { %750 = vmatpush.msra.mxu1 %v316_v15  ;;  %770 = vmatpush.msra.mxu2 %v364_v16  ;;  %v320_v14 = vld [vmem:[%s2552_s2 + $0x158] sm:$0xff] }
  0x54   : > { %790 = vmatpush.msra.mxu3 %v412_v17  ;;  %664 = vmatmul.f32.vlgmr.msrb.gmra.mxu0 %v1722_v3  ;;  %v368_v15 = vld [vmem:[%s2552_s2 + $0x2d8] sm:$0xff]  ;;  %v321_v17 = vld [vmem:[%s2552_s2 + $0x160] sm:$0xff] }
  0x55   : > { %751 = vmatpush.msra.mxu1 %v313_v18  ;;  %731 = vmatpush.msra.mxu0 %v558_v19  ;;  %v416_v16 = vld [vmem:[%s2552_s2 + $0x458] sm:$0xff]  ;;  %v317_v18 = vld [vmem:[%s2552_s2 + $0x140] sm:$0xff] }
  0x56   : > { %771 = vmatpush.msra.mxu2 %v361_v20  ;;  %791 = vmatpush.msra.mxu3 %v409_v21  ;;  %v365_v19 = vld [vmem:[%s2552_s2 + $0x2c0] sm:$0xff]  ;;  %v318_v21 = vld [vmem:[%s2552_s2 + $0x148] sm:$0xff] }
  0x57   : > { %684 = vmatmul.f32.vlgmr.msrb.gmra.mxu1 %v1729_v5  ;;  %732 = vmatpush.msra.mxu0 %v555_v22  ;;  %v413_v20 = vld [vmem:[%s2552_s2 + $0x440] sm:$0xff]  ;;  %v314_v22 = vld [vmem:[%s2552_s2 + $0x128] sm:$0xff] }
  0x58   : > { %752 = vmatpush.msra.mxu1 %v310_v23  ;;  %772 = vmatpush.msra.mxu2 %v358_v24  ;;  %v362_v23 = vld [vmem:[%s2552_s2 + $0x2a8] sm:$0xff] }
  0x59   : > { %792 = vmatpush.msra.mxu3 %v406_v25  ;;  %733 = vmatpush.msra.mxu0 %v552_v26  ;;  %v410_v24 = vld [vmem:[%s2552_s2 + $0x428] sm:$0xff]  ;;  %v315_v25 = vld [vmem:[%s2552_s2 + $0x130] sm:$0xff] }
  0x5a   : > { %753 = vmatpush.msra.mxu1 %v307_v27  ;;  %773 = vmatpush.msra.mxu2 %v355_v28  ;;  %v311_v26 = vld [vmem:[%s2552_s2 + $0x110] sm:$0xff] }
  0x5b   : > { %793 = vmatpush.msra.mxu3 %v403_v29  ;;  %734 = vmatpush.msra.mxu0 %v549_v30  ;;  %v359_v27 = vld [vmem:[%s2552_s2 + $0x290] sm:$0xff]  ;;  %v312_v29 = vld [vmem:[%s2552_s2 + $0x118] sm:$0xff] }
  0x5c   : > { %754 = vmatpush.msra.mxu1 %v304_v31  ;;  %774 = vmatpush.msra.mxu2 %v352_v32  ;;  %v407_v28 = vld [vmem:[%s2552_s2 + $0x410] sm:$0xff]  ;;  %v308_v30 = vld [vmem:[%s2552_s2 + $0xf8] sm:$0xff] }
  0x5d   : > { %794 = vmatpush.msra.mxu3 %v400_v33  ;;  %735 = vmatpush.msra.mxu0 %v546_v34  ;;  %v356_v31 = vld [vmem:[%s2552_s2 + $0x278] sm:$0xff]  ;;  %v309_v33 = vld [vmem:[%s2552_s2 + $0x100] sm:$0xff] }
  0x5e   : > { %755 = vmatpush.msra.mxu1 %v301_v35  ;;  %775 = vmatpush.msra.mxu2 %v349_v36  ;;  %v404_v32 = vld [vmem:[%s2552_s2 + $0x3f8] sm:$0xff]  ;;  %v353_v34 = vld [vmem:[%s2552_s2 + $0x260] sm:$0xff]  ;;  %v306_v36 = vld [vmem:[%s2552_s2 + $0xe8] sm:$0xff] }
  0x5f   : > { %795 = vmatpush.msra.mxu3 %v397_v37  ;;  %736 = vmatpush.msra.mxu0 %v543_v38  ;;  %v401_v35 = vld [vmem:[%s2552_s2 + $0x3e0] sm:$0xff]  ;;  %v302_v37 = vld [vmem:[%s2552_s2 + $0xc8] sm:$0xff] }
  0x60   : > { %756 = vmatpush.msra.mxu1 %v298_v39  ;;  %776 = vmatpush.msra.mxu2 %v346_v40  ;;  %v350_v38 = vld [vmem:[%s2552_s2 + $0x248] sm:$0xff]  ;;  %v303_v40 = vld [vmem:[%s2552_s2 + $0xd0] sm:$0xff] }
  0x61   : > { %796 = vmatpush.msra.mxu3 %v394_v41  ;;  %737 = vmatpush.msra.mxu0 %v540_v42  ;;  %v398_v39 = vld [vmem:[%s2552_s2 + $0x3c8] sm:$0xff]  ;;  %v299_v41 = vld [vmem:[%s2552_s2 + $0xb0] sm:$0xff] }
  0x62   : > { %757 = vmatpush.msra.mxu1 %v295_v43  ;;  %777 = vmatpush.msra.mxu2 %v343_v44  ;;  %v347_v42 = vld [vmem:[%s2552_s2 + $0x230] sm:$0xff]  ;;  %v300_v44 = vld [vmem:[%s2552_s2 + $0xb8] sm:$0xff] }
  0x63   : > { %797 = vmatpush.msra.mxu3 %v391_v45  ;;  %738 = vmatpush.msra.mxu0 %v537_v46  ;;  %v395_v43 = vld [vmem:[%s2552_s2 + $0x3b0] sm:$0xff]  ;;  %v296_v45 = vld [vmem:[%s2552_s2 + $0x98] sm:$0xff] }
  0x64   : > { %758 = vmatpush.msra.mxu1 %v292_v47  ;;  %778 = vmatpush.msra.mxu2 %v340_v48  ;;  %v344_v46 = vld [vmem:[%s2552_s2 + $0x218] sm:$0xff]  ;;  %v297_v48 = vld [vmem:[%s2552_s2 + $0xa0] sm:$0xff] }
  0x65   : > { %798 = vmatpush.msra.mxu3 %v388_v49  ;;  %739 = vmatpush.msra.mxu0 %v534_v50  ;;  %v392_v47 = vld [vmem:[%s2552_s2 + $0x398] sm:$0xff]  ;;  %v293_v49 = vld [vmem:[%s2552_s2 + $0x80] sm:$0xff] }
  0x66   : > { %759 = vmatpush.msra.mxu1 %v289_v51  ;;  %779 = vmatpush.msra.mxu2 %v337_v52  ;;  %v341_v50 = vld [vmem:[%s2552_s2 + $0x200] sm:$0xff]  ;;  %v294_v52 = vld [vmem:[%s2552_s2 + $0x88] sm:$0xff] }
  0x67   : > { %799 = vmatpush.msra.mxu3 %v385_v53  ;;  %704 = vmatmul.f32.vlgmr.msrb.gmra.mxu2 %v1706_v62  ;;  %v525_v62 = vld [vmem:[%s2553_s3 + $0x328] sm:$0xff]  ;;  %v389_v51 = vld [vmem:[%s2552_s2 + $0x380] sm:$0xff] }
  0x68   : > { %740 = vmatpush.msra.mxu0 %v531_v55  ;;  %760 = vmatpush.msra.mxu1 %v286_v56  ;;  %v290_v53 = vld [vmem:[%s2552_s2 + $0x68] sm:$0xff] }
  0x69   : > { %780 = vmatpush.msra.mxu2 %v334_v57  ;;  %800 = vmatpush.msra.mxu3 %v382_v58  ;;  %v338_v55 = vld [vmem:[%s2552_s2 + $0x1e8] sm:$0xff]  ;;  %v291_v57 = vld [vmem:[%s2552_s2 + $0x70] sm:$0xff] }
  0x6a   : > { %741 = vmatpush.msra.mxu0 %v528_v60  ;;  %724 = vmatmul.f32.vlgmr.msrb.gmra.mxu3 %v1722_v3  ;;  %v325_v3 = vld [vmem:[%s2552_s2 + $0x180] sm:$0xff]  ;;  %v386_v56 = vld [vmem:[%s2552_s2 + $0x368] sm:$0xff]  ;;  %v287_v58 = vld [vmem:[%s2552_s2 + $0x50] sm:$0xff] }
  0x6b   : > { %761 = vmatpush.msra.mxu1 %v283_v61  ;;  %781 = vmatpush.msra.mxu2 %v331_v0  ;;  %v335_v60 = vld [vmem:[%s2552_s2 + $0x1d0] sm:$0xff]  ;;  %v288_v0 = vld [vmem:[%s2552_s2 + $0x58] sm:$0xff] }
  0x6c   : > { %801 = vmatpush.msra.mxu3 %v379_v1  ;;  %742 = vmatpush.msra.mxu0 %v525_v62  ;;  %v383_v61 = vld [vmem:[%s2552_s2 + $0x350] sm:$0xff]  ;;  %v284_v1 = vld [vmem:[%s2552_s2 + $0x38] sm:$0xff] }
  0x6d   : > { %762 = vmatpush.msra.mxu1 %v280_v2  ;;  %782 = vmatpush.msra.mxu2 %v328_v4  ;;  %v332_v62 = vld [vmem:[%s2552_s2 + $0x1b8] sm:$0xff]  ;;  %v285_v4 = vld [vmem:[%s2552_s2 + $0x40] sm:$0xff] }
  0x6e   : > { %802 = vmatpush.msra.mxu3 %v376_v6  ;;  %743 = vmatpush.msra.mxu0 %v522_v7  ;;  %v380_v2 = vld [vmem:[%s2552_s2 + $0x338] sm:$0xff]  ;;  %v281_v6 = vld [vmem:[%s2552_s2 + $0x20] sm:$0xff] }
  0x6f   : > { %763 = vmatpush.msra.mxu1 %v277_v8  ;;  %783 = vmatpush.msra.mxu2 %v325_v3  ;;  %v329_v7 = vld [vmem:[%s2552_s2 + $0x1a0] sm:$0xff]  ;;  %v282_v3 = vld [vmem:[%s2552_s2 + $0x28] sm:$0xff] }
  0x70   : > { %803 = vmatpush.msra.mxu3 %v373_v9  ;;  %764 = vmatmul.f32.vlgmr.msra.gmra.mxu1 %v1681_v54  ;;  %v377_v8 = vld [vmem:[%s2552_s2 + $0x320] sm:$0xff]  ;;  %v278_v9 = vld [vmem:[%s2552_s2 + $0x8] sm:$0xff] }
  0x71   : > { %784 = vmatmul.f32.vlgmr.msra.gmra.mxu2 %v1696_v59  ;;  %808 = vmatpush.msrb.mxu0 %v323_v10  ;;  %v326_v10 = vld [vmem:[%s2552_s2 + $0x188] sm:$0xff] }
  0x72   : > { %828 = vmatpush.msrb.mxu1 %v371_v11  ;;  %848 = vmatpush.msrb.mxu2 %v419_v12  ;;  %v374_v11 = vld [vmem:[%s2552_s2 + $0x308] sm:$0xff]  ;;  %v279_v12 = vld [vmem:[%s2552_s2 + $0x10] sm:$0xff] }
  0x73   : > { %868 = vmatpush.msrb.mxu3 %v324_v13  ;;  %809 = vmatpush.msrb.mxu0 %v320_v14  ;;  %v372_v13 = vld [vmem:[%s2552_s2 + $0x2f8] sm:$0xff] }
  0x74   : > { %804 = vmatmul.f32.vlgmr.msra.gmra.mxu3 %v1709_v63  ;;  %829 = vmatpush.msrb.mxu1 %v368_v15  ;;  %v420_v14 = vld [vmem:[%s2552_s2 + $0x478] sm:$0xff]  ;;  %v973_v15 = vld [vmem:[%s2554_s4 + $0x168] sm:$0xff] }
  0x75   : > { %849 = vmatpush.msrb.mxu2 %v416_v16  ;;  %869 = vmatpush.msrb.mxu3 %v321_v17  ;;  %v1021_v16 = vld [vmem:[%s2554_s4 + $0x2e8] sm:$0xff]  ;;  %v369_v17 = vld [vmem:[%s2552_s2 + $0x2e0] sm:$0xff] }
  0x76   : > { %810 = vmatpush.msrb.mxu0 %v317_v18  ;;  %830 = vmatpush.msrb.mxu1 %v365_v19  ;;  %v417_v18 = vld [vmem:[%s2552_s2 + $0x460] sm:$0xff]  ;;  %v970_v19 = vld [vmem:[%s2554_s4 + $0x150] sm:$0xff] }
  0x77   : > { %850 = vmatpush.msrb.mxu2 %v413_v20  ;;  %870 = vmatpush.msrb.mxu3 %v318_v21  ;;  %v1018_v20 = vld [vmem:[%s2554_s4 + $0x2d0] sm:$0xff]  ;;  %v414_v21 = vld [vmem:[%s2552_s2 + $0x448] sm:$0xff] }
  0x78   : > { %811 = vmatpush.msrb.mxu0 %v314_v22  ;;  %831 = vmatpush.msrb.mxu1 %v362_v23  ;;  %v967_v22 = vld [vmem:[%s2554_s4 + $0x138] sm:$0xff] }
  0x79   : > { %851 = vmatpush.msrb.mxu2 %v410_v24  ;;  %871 = vmatpush.msrb.mxu3 %v315_v25  ;;  %v1015_v23 = vld [vmem:[%s2554_s4 + $0x2b8] sm:$0xff]  ;;  %v363_v24 = vld [vmem:[%s2552_s2 + $0x2b0] sm:$0xff] }
  0x7a   : > { %744 = vmatmul.f32.vlgmr.msra.gmra.mxu0 %v1729_v5  ;;  %832 = vmatpush.msrb.mxu1 %v359_v27  ;;  %v305_v5 = vld [vmem:[%s2552_s2 + $0xe0] sm:$0xff]  ;;  %v411_v25 = vld [vmem:[%s2552_s2 + $0x430] sm:$0xff] }
  0x7b   : > { %812 = vmatpush.msrb.mxu0 %v311_v26  ;;  %852 = vmatpush.msrb.mxu2 %v407_v28  ;;  %v964_v26 = vld [vmem:[%s2554_s4 + $0x120] sm:$0xff]  ;;  %v360_v28 = vld [vmem:[%s2552_s2 + $0x298] sm:$0xff] }
  0x7c   : > { %872 = vmatpush.msrb.mxu3 %v312_v29  ;;  %833 = vmatpush.msrb.mxu1 %v356_v31  ;;  %v1012_v27 = vld [vmem:[%s2554_s4 + $0x2a0] sm:$0xff]  ;;  %v408_v29 = vld [vmem:[%s2552_s2 + $0x418] sm:$0xff]  ;;  %v1009_v31 = vld [vmem:[%s2554_s4 + $0x288] sm:$0xff] }
  0x7d   : > { %813 = vmatpush.msrb.mxu0 %v308_v30  ;;  %853 = vmatpush.msrb.mxu2 %v404_v32  ;;  %v961_v30 = vld [vmem:[%s2554_s4 + $0x108] sm:$0xff]  ;;  %v357_v32 = vld [vmem:[%s2552_s2 + $0x280] sm:$0xff] }
  0x7e   : > { %873 = vmatpush.msrb.mxu3 %v309_v33  ;;  %834 = vmatpush.msrb.mxu1 %v353_v34  ;;  %v405_v33 = vld [vmem:[%s2552_s2 + $0x400] sm:$0xff]  ;;  %v1006_v34 = vld [vmem:[%s2554_s4 + $0x270] sm:$0xff] }
  0x7f   : > { %814 = vmatpush.msrb.mxu0 %v305_v5  ;;  %854 = vmatpush.msrb.mxu2 %v401_v35  ;;  %v958_v5 = vld [vmem:[%s2554_s4 + $0xf0] sm:$0xff]  ;;  %v354_v35 = vld [vmem:[%s2552_s2 + $0x268] sm:$0xff] }
  0x80   : > { %874 = vmatpush.msrb.mxu3 %v306_v36  ;;  %835 = vmatpush.msrb.mxu1 %v350_v38  ;;  %v402_v36 = vld [vmem:[%s2552_s2 + $0x3e8] sm:$0xff]  ;;  %v1003_v38 = vld [vmem:[%s2554_s4 + $0x258] sm:$0xff] }
  0x81   : > { %815 = vmatpush.msrb.mxu0 %v302_v37  ;;  %855 = vmatpush.msrb.mxu2 %v398_v39  ;;  %v955_v37 = vld [vmem:[%s2554_s4 + $0xd8] sm:$0xff]  ;;  %v351_v39 = vld [vmem:[%s2552_s2 + $0x250] sm:$0xff] }
  0x82   : > { %875 = vmatpush.msrb.mxu3 %v303_v40  ;;  %836 = vmatpush.msrb.mxu1 %v347_v42  ;;  %v399_v40 = vld [vmem:[%s2552_s2 + $0x3d0] sm:$0xff]  ;;  %v1000_v42 = vld [vmem:[%s2554_s4 + $0x240] sm:$0xff] }
  0x83   : > { %816 = vmatpush.msrb.mxu0 %v299_v41  ;;  %856 = vmatpush.msrb.mxu2 %v395_v43  ;;  %v952_v41 = vld [vmem:[%s2554_s4 + $0xc0] sm:$0xff]  ;;  %v348_v43 = vld [vmem:[%s2552_s2 + $0x238] sm:$0xff] }
  0x84   : > { %876 = vmatpush.msrb.mxu3 %v300_v44  ;;  %837 = vmatpush.msrb.mxu1 %v344_v46  ;;  %v396_v44 = vld [vmem:[%s2552_s2 + $0x3b8] sm:$0xff]  ;;  %v997_v46 = vld [vmem:[%s2554_s4 + $0x228] sm:$0xff] }
  0x85   : > { %817 = vmatpush.msrb.mxu0 %v296_v45  ;;  %857 = vmatpush.msrb.mxu2 %v392_v47  ;;  %v949_v45 = vld [vmem:[%s2554_s4 + $0xa8] sm:$0xff]  ;;  %v345_v47 = vld [vmem:[%s2552_s2 + $0x220] sm:$0xff] }
  0x86   : > { %877 = vmatpush.msrb.mxu3 %v297_v48  ;;  %838 = vmatpush.msrb.mxu1 %v341_v50  ;;  %v393_v48 = vld [vmem:[%s2552_s2 + $0x3a0] sm:$0xff]  ;;  %v994_v50 = vld [vmem:[%s2554_s4 + $0x210] sm:$0xff] }
  0x87   : > { %818 = vmatpush.msrb.mxu0 %v293_v49  ;;  %858 = vmatpush.msrb.mxu2 %v389_v51  ;;  %v946_v49 = vld [vmem:[%s2554_s4 + $0x90] sm:$0xff]  ;;  %v342_v51 = vld [vmem:[%s2552_s2 + $0x208] sm:$0xff] }
  0x88   : > { %878 = vmatpush.msrb.mxu3 %v294_v52  ;;  %839 = vmatpush.msrb.mxu1 %v338_v55  ;;  %v390_v52 = vld [vmem:[%s2552_s2 + $0x388] sm:$0xff]  ;;  %v991_v55 = vld [vmem:[%s2554_s4 + $0x1f8] sm:$0xff] }
  0x89   : > { %819 = vmatpush.msrb.mxu0 %v290_v53  ;;  %859 = vmatpush.msrb.mxu2 %v386_v56  ;;  %v943_v53 = vld [vmem:[%s2554_s4 + $0x78] sm:$0xff]  ;;  %v339_v56 = vld [vmem:[%s2552_s2 + $0x1f0] sm:$0xff] }
  0x8a   : > { %879 = vmatpush.msrb.mxu3 %v291_v57  ;;  %840 = vmatpush.msrb.mxu1 %v335_v60  ;;  %v387_v57 = vld [vmem:[%s2552_s2 + $0x370] sm:$0xff]  ;;  %v988_v60 = vld [vmem:[%s2554_s4 + $0x1e0] sm:$0xff] }
  0x8b   : > { %820 = vmatpush.msrb.mxu0 %v287_v58  ;;  %860 = vmatpush.msrb.mxu2 %v383_v61  ;;  %v940_v58 = vld [vmem:[%s2554_s4 + $0x60] sm:$0xff]  ;;  %v336_v61 = vld [vmem:[%s2552_s2 + $0x1d8] sm:$0xff] }
  0x8c   : > { %880 = vmatpush.msrb.mxu3 %v288_v0  ;;  %841 = vmatpush.msrb.mxu1 %v332_v62  ;;  %v384_v0 = vld [vmem:[%s2552_s2 + $0x358] sm:$0xff]  ;;  %v985_v62 = vld [vmem:[%s2554_s4 + $0x1c8] sm:$0xff] }
  0x8d   : > { %821 = vmatpush.msrb.mxu0 %v284_v1  ;;  %861 = vmatpush.msrb.mxu2 %v380_v2  ;;  %v937_v1 = vld [vmem:[%s2554_s4 + $0x48] sm:$0xff]  ;;  %v333_v2 = vld [vmem:[%s2552_s2 + $0x1c0] sm:$0xff] }
  0x8e   : > { %881 = vmatpush.msrb.mxu3 %v285_v4  ;;  %842 = vmatpush.msrb.mxu1 %v329_v7  ;;  %v381_v4 = vld [vmem:[%s2552_s2 + $0x340] sm:$0xff]  ;;  %v982_v7 = vld [vmem:[%s2554_s4 + $0x1b0] sm:$0xff] }
  0x8f   : > { %822 = vmatpush.msrb.mxu0 %v281_v6  ;;  %862 = vmatpush.msrb.mxu2 %v377_v8  ;;  %v934_v6 = vld [vmem:[%s2554_s4 + $0x30] sm:$0xff]  ;;  %v330_v8 = vld [vmem:[%s2552_s2 + $0x1a8] sm:$0xff] }
  0x90   : > { %882 = vmatpush.msrb.mxu3 %v282_v3  ;;  %843 = vmatpush.msrb.mxu1 %v326_v10  ;;  %v378_v3 = vld [vmem:[%s2552_s2 + $0x328] sm:$0xff]  ;;  %v979_v10 = vld [vmem:[%s2554_s4 + $0x198] sm:$0xff] }
  0x91   : > { %823 = vmatpush.msrb.mxu0 %v278_v9  ;;  %863 = vmatpush.msrb.mxu2 %v374_v11  ;;  %v931_v9 = vld [vmem:[%s2554_s4 + $0x18] sm:$0xff]  ;;  %v327_v11 = vld [vmem:[%s2552_s2 + $0x190] sm:$0xff] }
  0x92   : > { %883 = vmatpush.msrb.mxu3 %v279_v12  ;;  %824 = vmatmul.f32.vlgmr.msrb.gmra.mxu0 %v1681_v54  ;;  %v375_v12 = vld [vmem:[%s2552_s2 + $0x310] sm:$0xff] }
  0x93   : > { %864 = vmatmul.f32.vlgmr.msrb.gmra.mxu2 %v1709_v63  ;;  %884 = vmatmul.f32.vlgmr.msrb.gmra.mxu3 %v1681_v54  ;;  %v366_v54 = vld [vmem:[%s2552_s2 + $0x2c8] sm:$0xff] }
  0x94   : > { %888 = vmatpush.msra.mxu0 %v372_v13  ;;  %908 = vmatpush.msra.mxu1 %v420_v14  ;;  %v928_v13 = vld [vmem:[%s2554_s4] sm:$0xff] }
  0x95   : > { %1024 = vmatpush.msra.mxu2 %v973_v15  ;;  %1044 = vmatpush.msra.mxu3 %v1021_v16  ;;  %v976_v14 = vld [vmem:[%s2554_s4 + $0x180] sm:$0xff]  ;;  %v2329_v16 = vld [vmem:[%s266_s20 + $0x8] sm:$0xff] }
  0x96   : > { %844 = vmatmul.f32.vlgmr.msrb.gmra.mxu1 %v1696_v59  ;;  %889 = vmatpush.msra.mxu0 %v369_v17  ;;  %v2327_v15 = vld [vmem:[%s266_s20] sm:$0xff]  ;;  %v974_v17 = vld [vmem:[%s2554_s4 + $0x170] sm:$0xff] }
  0x97   : > { %909 = vmatpush.msra.mxu1 %v417_v18  ;;  %1025 = vmatpush.msra.mxu2 %v970_v19  ;;  %v1022_v18 = vld [vmem:[%s2554_s4 + $0x2f0] sm:$0xff]  ;;  %v975_v19 = vld [vmem:[%s2554_s4 + $0x178] sm:$0xff] }
  0x98   : > { %1045 = vmatpush.msra.mxu3 %v1018_v20  ;;  %890 = vmatpush.msra.mxu0 %v366_v54  ;;  %v1023_v20 = vld [vmem:[%s2554_s4 + $0x2f8] sm:$0xff] }
  0x99   : > { %910 = vmatpush.msra.mxu1 %v414_v21  ;;  %1026 = vmatpush.msra.mxu2 %v967_v22  ;;  %v971_v54 = vld [vmem:[%s2554_s4 + $0x158] sm:$0xff]  ;;  %v1020_v22 = vld [vmem:[%s2554_s4 + $0x2e0] sm:$0xff] }
  0x9a   : > { %1046 = vmatpush.msra.mxu3 %v1015_v23  ;;  %891 = vmatpush.msra.mxu0 %v363_v24  ;;  %v1019_v21 = vld [vmem:[%s2554_s4 + $0x2d8] sm:$0xff]  ;;  %v968_v23 = vld [vmem:[%s2554_s4 + $0x140] sm:$0xff] }
  0x9b   : > { %911 = vmatpush.msra.mxu1 %v411_v25  ;;  %1027 = vmatpush.msra.mxu2 %v964_v26  ;;  %v1016_v24 = vld [vmem:[%s2554_s4 + $0x2c0] sm:$0xff]  ;;  %v969_v25 = vld [vmem:[%s2554_s4 + $0x148] sm:$0xff] }
  0x9c   : > { %1047 = vmatpush.msra.mxu3 %v1012_v27  ;;  %892 = vmatpush.msra.mxu0 %v360_v28  ;;  %v1017_v26 = vld [vmem:[%s2554_s4 + $0x2c8] sm:$0xff]  ;;  %v966_v28 = vld [vmem:[%s2554_s4 + $0x130] sm:$0xff] }
  0x9d   : > { %912 = vmatpush.msra.mxu1 %v408_v29  ;;  %1028 = vmatpush.msra.mxu2 %v961_v30  ;;  %v1013_v27 = vld [vmem:[%s2554_s4 + $0x2a8] sm:$0xff]  ;;  %v1014_v29 = vld [vmem:[%s2554_s4 + $0x2b0] sm:$0xff] }
  0x9e   : > { %1048 = vmatpush.msra.mxu3 %v1009_v31  ;;  %893 = vmatpush.msra.mxu0 %v357_v32  ;;  %v962_v30 = vld [vmem:[%s2554_s4 + $0x110] sm:$0xff]  ;;  %v963_v32 = vld [vmem:[%s2554_s4 + $0x118] sm:$0xff] }
  0x9f   : > { %913 = vmatpush.msra.mxu1 %v405_v33  ;;  %1029 = vmatpush.msra.mxu2 %v958_v5  ;;  %v1010_v31 = vld [vmem:[%s2554_s4 + $0x290] sm:$0xff]  ;;  %v1011_v33 = vld [vmem:[%s2554_s4 + $0x298] sm:$0xff] }
  0xa0   : > { %1049 = vmatpush.msra.mxu3 %v1006_v34  ;;  %894 = vmatpush.msra.mxu0 %v354_v35  ;;  %v959_v5 = vld [vmem:[%s2554_s4 + $0xf8] sm:$0xff]  ;;  %v960_v35 = vld [vmem:[%s2554_s4 + $0x100] sm:$0xff] }
  0xa1   : > { %914 = vmatpush.msra.mxu1 %v402_v36  ;;  %1030 = vmatpush.msra.mxu2 %v955_v37  ;;  %v1007_v34 = vld [vmem:[%s2554_s4 + $0x278] sm:$0xff]  ;;  %v1008_v36 = vld [vmem:[%s2554_s4 + $0x280] sm:$0xff] }
  0xa2   : > { %1050 = vmatpush.msra.mxu3 %v1003_v38  ;;  %895 = vmatpush.msra.mxu0 %v351_v39  ;;  %v956_v37 = vld [vmem:[%s2554_s4 + $0xe0] sm:$0xff]  ;;  %v957_v39 = vld [vmem:[%s2554_s4 + $0xe8] sm:$0xff] }
  0xa3   : > { %915 = vmatpush.msra.mxu1 %v399_v40  ;;  %1031 = vmatpush.msra.mxu2 %v952_v41  ;;  %v1004_v38 = vld [vmem:[%s2554_s4 + $0x260] sm:$0xff]  ;;  %v1005_v40 = vld [vmem:[%s2554_s4 + $0x268] sm:$0xff] }
  0xa4   : > { %1051 = vmatpush.msra.mxu3 %v1000_v42  ;;  %896 = vmatpush.msra.mxu0 %v348_v43  ;;  %v953_v41 = vld [vmem:[%s2554_s4 + $0xc8] sm:$0xff]  ;;  %v954_v43 = vld [vmem:[%s2554_s4 + $0xd0] sm:$0xff] }
  0xa5   : > { %916 = vmatpush.msra.mxu1 %v396_v44  ;;  %1032 = vmatpush.msra.mxu2 %v949_v45  ;;  %v1001_v42 = vld [vmem:[%s2554_s4 + $0x248] sm:$0xff]  ;;  %v1002_v44 = vld [vmem:[%s2554_s4 + $0x250] sm:$0xff] }
  0xa6   : > { %1052 = vmatpush.msra.mxu3 %v997_v46  ;;  %897 = vmatpush.msra.mxu0 %v345_v47  ;;  %v950_v45 = vld [vmem:[%s2554_s4 + $0xb0] sm:$0xff]  ;;  %v951_v47 = vld [vmem:[%s2554_s4 + $0xb8] sm:$0xff] }
  0xa7   : > { %917 = vmatpush.msra.mxu1 %v393_v48  ;;  %1033 = vmatpush.msra.mxu2 %v946_v49  ;;  %v998_v46 = vld [vmem:[%s2554_s4 + $0x230] sm:$0xff]  ;;  %v999_v48 = vld [vmem:[%s2554_s4 + $0x238] sm:$0xff] }
  0xa8   : > { %1053 = vmatpush.msra.mxu3 %v994_v50  ;;  %898 = vmatpush.msra.mxu0 %v342_v51  ;;  %v947_v49 = vld [vmem:[%s2554_s4 + $0x98] sm:$0xff]  ;;  %v948_v51 = vld [vmem:[%s2554_s4 + $0xa0] sm:$0xff] }
  0xa9   : > { %918 = vmatpush.msra.mxu1 %v390_v52  ;;  %1034 = vmatpush.msra.mxu2 %v943_v53  ;;  %v995_v50 = vld [vmem:[%s2554_s4 + $0x218] sm:$0xff]  ;;  %v996_v52 = vld [vmem:[%s2554_s4 + $0x220] sm:$0xff] }
  0xaa   : > { %1054 = vmatpush.msra.mxu3 %v991_v55  ;;  %899 = vmatpush.msra.mxu0 %v339_v56  ;;  %v944_v53 = vld [vmem:[%s2554_s4 + $0x80] sm:$0xff]  ;;  %v945_v56 = vld [vmem:[%s2554_s4 + $0x88] sm:$0xff] }
  0xab   : > { %919 = vmatpush.msra.mxu1 %v387_v57  ;;  %1035 = vmatpush.msra.mxu2 %v940_v58  ;;  %v992_v55 = vld [vmem:[%s2554_s4 + $0x200] sm:$0xff]  ;;  %v993_v57 = vld [vmem:[%s2554_s4 + $0x208] sm:$0xff] }
  0xac   : > { %1055 = vmatpush.msra.mxu3 %v988_v60  ;;  %900 = vmatpush.msra.mxu0 %v336_v61  ;;  %v941_v58 = vld [vmem:[%s2554_s4 + $0x68] sm:$0xff]  ;;  %v942_v61 = vld [vmem:[%s2554_s4 + $0x70] sm:$0xff] }
  0xad   : > { %920 = vmatpush.msra.mxu1 %v384_v0  ;;  %1036 = vmatpush.msra.mxu2 %v937_v1  ;;  %v989_v60 = vld [vmem:[%s2554_s4 + $0x1e8] sm:$0xff]  ;;  %v990_v0 = vld [vmem:[%s2554_s4 + $0x1f0] sm:$0xff] }
  0xae   : > { %1056 = vmatpush.msra.mxu3 %v985_v62  ;;  %901 = vmatpush.msra.mxu0 %v333_v2  ;;  %v938_v1 = vld [vmem:[%s2554_s4 + $0x50] sm:$0xff]  ;;  %v939_v2 = vld [vmem:[%s2554_s4 + $0x58] sm:$0xff] }
  0xaf   : > { %921 = vmatpush.msra.mxu1 %v381_v4  ;;  %1037 = vmatpush.msra.mxu2 %v934_v6  ;;  %v986_v62 = vld [vmem:[%s2554_s4 + $0x1d0] sm:$0xff]  ;;  %v987_v4 = vld [vmem:[%s2554_s4 + $0x1d8] sm:$0xff] }
  0xb0   : > { %1057 = vmatpush.msra.mxu3 %v982_v7  ;;  %902 = vmatpush.msra.mxu0 %v330_v8  ;;  %v935_v6 = vld [vmem:[%s2554_s4 + $0x38] sm:$0xff]  ;;  %v936_v8 = vld [vmem:[%s2554_s4 + $0x40] sm:$0xff] }
  0xb1   : > { %922 = vmatpush.msra.mxu1 %v378_v3  ;;  %1038 = vmatpush.msra.mxu2 %v931_v9  ;;  %v983_v7 = vld [vmem:[%s2554_s4 + $0x1b8] sm:$0xff]  ;;  %v984_v3 = vld [vmem:[%s2554_s4 + $0x1c0] sm:$0xff] }
  0xb2   : > { %1058 = vmatpush.msra.mxu3 %v979_v10  ;;  %903 = vmatpush.msra.mxu0 %v327_v11  ;;  %v932_v9 = vld [vmem:[%s2554_s4 + $0x20] sm:$0xff]  ;;  %v933_v11 = vld [vmem:[%s2554_s4 + $0x28] sm:$0xff] }
  0xb3   : > { %923 = vmatpush.msra.mxu1 %v375_v12  ;;  %1039 = vmatpush.msra.mxu2 %v928_v13  ;;  %v980_v10 = vld [vmem:[%s2554_s4 + $0x1a0] sm:$0xff]  ;;  %v981_v12 = vld [vmem:[%s2554_s4 + $0x1a8] sm:$0xff] }
  0xb4   : > { %1059 = vmatpush.msra.mxu3 %v976_v14  ;;  %904 = vmatmul.f32.vlgmr.msra.gmra.mxu0 %v1696_v59  ;;  %v972_v59 = vld [vmem:[%s2554_s4 + $0x160] sm:$0xff]  ;;  %v929_v13 = vld [vmem:[%s2554_s4 + $0x8] sm:$0xff] }
  0xb5   : > { %1040 = vmatmul.f32.vlgmr.msra.gmra.mxu2 %v2327_v15  ;;  %1060 = vmatmul.f32.vlgmr.msra.gmra.mxu3 %v2329_v16  ;;  %v977_v14 = vld [vmem:[%s2554_s4 + $0x188] sm:$0xff] }
  0xb6   : > { %1064 = vmatpush.msrb.mxu0 %v974_v17  ;;  %1084 = vmatpush.msrb.mxu1 %v1022_v18  ;;  %v930_v17 = vld [vmem:[%s2554_s4 + $0x10] sm:$0xff] }
  0xb7   : > { %1104 = vmatpush.msrb.mxu2 %v975_v19  ;;  %1124 = vmatpush.msrb.mxu3 %v1023_v20  ;;  %v978_v18 = vld [vmem:[%s2554_s4 + $0x190] sm:$0xff] }
  0xb8   : > { %924 = vmatmul.f32.vlgmr.msra.gmra.mxu1 %v1709_v63  ;;  %1065 = vmatpush.msrb.mxu0 %v971_v54  ;;  %v965_v63 = vld [vmem:[%s2554_s4 + $0x128] sm:$0xff] }
  0xb9   : > { %1085 = vmatpush.msrb.mxu1 %v1019_v21  ;;  %1105 = vmatpush.msrb.mxu2 %v972_v59 }
  0xba   : > { %1125 = vmatpush.msrb.mxu3 %v1020_v22  ;;  %1066 = vmatpush.msrb.mxu0 %v968_v23 }
  0xbb   : > { %1086 = vmatpush.msrb.mxu1 %v1016_v24  ;;  %1106 = vmatpush.msrb.mxu2 %v969_v25 }
  0xbc   : > { %1126 = vmatpush.msrb.mxu3 %v1017_v26  ;;  %1067 = vmatpush.msrb.mxu0 %v965_v63 }
  0xbd   : > { %1087 = vmatpush.msrb.mxu1 %v1013_v27  ;;  %1107 = vmatpush.msrb.mxu2 %v966_v28 }
  0xbe   : > { %1127 = vmatpush.msrb.mxu3 %v1014_v29  ;;  %1068 = vmatpush.msrb.mxu0 %v962_v30 }
  0xbf   : > { %1088 = vmatpush.msrb.mxu1 %v1010_v31  ;;  %1108 = vmatpush.msrb.mxu2 %v963_v32 }
  0xc0   : > { %1128 = vmatpush.msrb.mxu3 %v1011_v33  ;;  %1069 = vmatpush.msrb.mxu0 %v959_v5  ;;  %v1150_v33 = vld [vmem:[%s2555_s5] sm:$0x7] }
  0xc1   : > { %1089 = vmatpush.msrb.mxu1 %v1007_v34  ;;  %1109 = vmatpush.msrb.mxu2 %v960_v35 }
  0xc2   : > { %1129 = vmatpush.msrb.mxu3 %v1008_v36  ;;  %1070 = vmatpush.msrb.mxu0 %v956_v37  ;;  %v1152_v37 = vperm.slane %v1150_v33, 0 }
  0xc3   : > { %1090 = vmatpush.msrb.mxu1 %v1004_v38  ;;  %1110 = vmatpush.msrb.mxu2 %v957_v39  ;;  %v1252_v38 = vld [vmem:[%s1660_s7] sm:$0xff] }
  0xc4   : > { %1130 = vmatpush.msrb.mxu3 %v1005_v40  ;;  %1071 = vmatpush.msrb.mxu0 %v953_v41 }
  0xc5   : > { %1091 = vmatpush.msrb.mxu1 %v1001_v42  ;;  %1111 = vmatpush.msrb.mxu2 %v954_v43 }
  0xc6   : > { %1131 = vmatpush.msrb.mxu3 %v1002_v44  ;;  %1072 = vmatpush.msrb.mxu0 %v950_v45 }
  0xc7   : > { %1092 = vmatpush.msrb.mxu1 %v998_v46  ;;  %1112 = vmatpush.msrb.mxu2 %v951_v47  ;;  %v585_v25 = vpop.f32.mrf.mxu0 }
  0xc8   : > { %1132 = vmatpush.msrb.mxu3 %v999_v48  ;;  %1073 = vmatpush.msrb.mxu0 %v947_v49 }
  0xc9   : > { %1093 = vmatpush.msrb.mxu1 %v995_v50  ;;  %1113 = vmatpush.msrb.mxu2 %v948_v51 }
  0xca   : > { %1133 = vmatpush.msrb.mxu3 %v996_v52  ;;  %1074 = vmatpush.msrb.mxu0 %v944_v53  ;;  %v605_v21 = vpop.f32.mrf.mxu1 }
  0xcb   : > { %1094 = vmatpush.msrb.mxu1 %v992_v55  ;;  %1114 = vmatpush.msrb.mxu2 %v945_v56  ;;  %v606_v26 = vadd.f32 %v605_v21, %v585_v25 }
  0xcc   : > { %1134 = vmatpush.msrb.mxu3 %v993_v57  ;;  %1075 = vmatpush.msrb.mxu0 %v941_v58  ;;  %v1153_v58 = vperm.slane %v1150_v33, 1 }
  0xcd   : > { %1095 = vmatpush.msrb.mxu1 %v989_v60  ;;  %1115 = vmatpush.msrb.mxu2 %v942_v61  ;;  %v1253_v61 = vld [vmem:[%s1660_s7 + $0x8] sm:$0xff] }
  0xce   : > { %1135 = vmatpush.msrb.mxu3 %v990_v0  ;;  %1076 = vmatpush.msrb.mxu0 %v938_v1 }
  0xcf   : > { %1096 = vmatpush.msrb.mxu1 %v986_v62  ;;  %1116 = vmatpush.msrb.mxu2 %v939_v2 }
  0xd0   : > { %1136 = vmatpush.msrb.mxu3 %v987_v4  ;;  %1077 = vmatpush.msrb.mxu0 %v935_v6  ;;  %v625_v19 = vpop.f32.mrf.mxu2 }
  0xd1   : > { %1097 = vmatpush.msrb.mxu1 %v983_v7  ;;  %1117 = vmatpush.msrb.mxu2 %v936_v8  ;;  %v645_v20 = vpop.f32.mrf.mxu3  ;;  %v626_v29 = vadd.f32 %v625_v19, %v606_v26  ;;  %v665_v30 = vpop.f32.mrf.mxu0  ;;  %v1154_v8 = vperm.slane %v1150_v33, 2 }
  0xd2   : > { %1137 = vmatpush.msrb.mxu3 %v984_v3  ;;  %1078 = vmatpush.msrb.mxu0 %v932_v9  ;;  %v666_v43 = vadd.f32 %v665_v30, %v645_v20  ;;  %v1254_v3 = vld [vmem:[%s1660_s7 + $0x10] sm:$0xff] }
  0xd3   : > { %1098 = vmatpush.msrb.mxu1 %v980_v10  ;;  %1118 = vmatpush.msrb.mxu2 %v933_v11 }
  0xd4   : > { %1138 = vmatpush.msrb.mxu3 %v981_v12  ;;  %1079 = vmatpush.msrb.mxu0 %v929_v13  ;;  %v685_v23 = vpop.f32.mrf.mxu1 }
  0xd5   : > { %1099 = vmatpush.msrb.mxu1 %v977_v14  ;;  %1119 = vmatpush.msrb.mxu2 %v930_v17  ;;  %v686_v46 = vadd.f32 %v685_v23, %v666_v43 }
  0xd6   : > { %1139 = vmatpush.msrb.mxu3 %v978_v18  ;;  %1080 = vmatmul.f32.vlgmr.msrb.gmra.mxu0 %v2327_v15 }
  0xd7   : > { %1100 = vmatmul.f32.vlgmr.msrb.gmra.mxu1 %v2329_v16  ;;  %1120 = vmatmul.f32.vlgmr.msrb.gmra.mxu2 %v2327_v15 }
  0xd8   : > { %1140 = vmatmul.f32.vlgmr.msrb.gmra.mxu3 %v2329_v16 }
  0xea   : > { %v705_v54 = vpop.f32.mrf.mxu2 }
  0xed   : > { %v725_v59 = vpop.f32.mrf.mxu3  ;;  %v765_v27 = vpop.f32.mrf.mxu1 }
  0xee   : > { %v766_v15 = vadd.f32 %v765_v27, %v626_v29  ;;  %v726_v48 = vadd.f32 %v725_v59, %v705_v54 }
  0xf4   : > { %v785_v22 = vpop.f32.mrf.mxu2 }
  0xf5   : > { %v786_v31 = vadd.f32 %v785_v22, %v766_v15 }
  0xf7   : > { %v805_v24 = vpop.f32.mrf.mxu3  ;;  %v745_v35 = vpop.f32.mrf.mxu0 }
  0xf8   : > { %v806_v5 = vadd.f32 %v805_v24, %v786_v31  ;;  %v746_v50 = vadd.f32 %v745_v35, %v726_v48 }
 0x10f   : > { %v825_v41 = vpop.f32.mrf.mxu0 }
 0x110   : > { %v826_v47 = vadd.f32 %v825_v41, %v686_v46 }
 0x113   : > { %v845_v42 = vpop.f32.mrf.mxu1 }
 0x114   : > { %v846_v49 = vadd.f32 %v845_v42, %v826_v47 }
 0x116   : > { %v865_v63 = vpop.f32.mrf.mxu2  ;;  %v885_v28 = vpop.f32.mrf.mxu3 }
 0x117   : > { %v866_v53 = vadd.f32 %v865_v63, %v846_v49  ;;  %v886_v56 = vadd.f32 %v885_v28, %v746_v50 }
 0x131   : > { %v905_v44 = vpop.f32.mrf.mxu0 }
 0x132   : > { %v906_v60 = vadd.f32 %v905_v44, %v886_v56 }
 0x135   : > { %v925_v45 = vpop.f32.mrf.mxu1 }
 0x136   : > { %v926_v4 = vadd.f32 %v925_v45, %v906_v60 }
 0x138   : > { %v1041_v16 = vpop.f32.mrf.mxu2  ;;  %v1061_v32 = vpop.f32.mrf.mxu3 }
 0x139   : > { %v1062_v34 = vadd.f32 %v1061_v32, %v1041_v16 }
 0x13b   : > { %v1144_v36 = vadd.f32 %v1062_v34, %v806_v5 }
 0x13d   : > { %v1147_v39 = vadd.f32 %v1252_v38, %v1144_v36 }
 0x13f   : > { %v1158_v40 = vadd.f32 %v1152_v37, %v1147_v39 }
 0x141   : > { %1161 = vst [vmem:[%s2540_s24] sm:$0xff] %v1158_v40 }
 0x153   : > { %v1081_v51 = vpop.f32.mrf.mxu0 }
 0x154   : > { %v1101_v52 = vpop.f32.mrf.mxu1 }
 0x155   : > { %v1102_v55 = vadd.f32 %v1101_v52, %v1081_v51 }
 0x157   : > { %v1145_v57 = vadd.f32 %v1102_v55, %v866_v53 }
 0x159   : > { %v1148_v0 = vadd.f32 %v1253_v61, %v1145_v57 }
 0x15a   : > { %v1121_v62 = vpop.f32.mrf.mxu2 }
 0x15b   : > { %v1159_v1 = vadd.f32 %v1153_v58, %v1148_v0  ;;  %v1141_v2 = vpop.f32.mrf.mxu3 }
 0x15c   : > { %v1142_v6 = vadd.f32 %v1141_v2, %v1121_v62 }
 0x15d   : > { %1162 = vst [vmem:[%s2540_s24 + $0x8] sm:$0xff] %v1159_v1 }
 0x15e   : > { %v1146_v7 = vadd.f32 %v1142_v6, %v926_v4 }
 0x160   : > { %v1149_v9 = vadd.f32 %v1254_v3, %v1146_v7 }
 0x162   : > { %v1160_v10 = vadd.f32 %v1154_v8, %v1149_v9 }
 0x164   : > { %1163 = vst [vmem:[%s2540_s24 + $0x10] sm:$0xff] %v1160_v10 }
 0x165 PF: > { %s16_s21 = sadd.s32 1, %s1261_s21  }
 0x166   : > { %p13_p4 = scmp.ge.s32.totalorder %s16_s21, 4  }
 0x168   :  { %15 = sbr.rel (!%p13_p4) target bundleno = 1 (0x1), region = 77 }

</bundles_post_ra>
